<compile_context>
chip_gen: v7x
topology: tpu7x:2x2x1
jax: 0.10.0
libtpu: 0.0.40
codegen_flags: <defaults>
</compile_context>

<pallas_src>
import jax
import jax.numpy as jnp
from jax.experimental import pallas as pl
from jax.experimental.pallas import tpu as pltpu


def _ocgin_fused_kernel(x_ref, adj_ref, pool_ref, *rest):
    """Fused multi-layer GIN forward for one block of Bt graphs.

    x_ref    : [Bt*N, F]     bf16 node features, graphs packed row-wise
    adj_ref  : [Bt*N, Bt*N]  bf16 block-diagonal adjacency, (1+eps)*I folded in
    pool_ref : [Bt,  Bt*N]   bf16 sum-pool selector (pool[g, i]=1 iff row i in graph g)
    rest     : per-layer (w1 bf16, b1 f32, w2 bf16, b2 f32) refs, then
               z_ref f32 [Bt, out_width] (out_width = L*H padded up to 128 lanes)
    """
    z_ref = rest[-1]
    param_refs = rest[:-1]
    num_layers = len(param_refs) // 4

    Bt, out_width = z_ref.shape
    H = param_refs[1].shape[-1]

    adj = adj_ref[...]          # [BtN, BtN] bf16 (block-diag, self term folded)
    pool = pool_ref[...]        # [Bt, BtN]  bf16
    h = x_ref[...]              # [BtN, F]   bf16 — stays flat for all layers

    pooled = []
    for l in range(num_layers):
        w1 = param_refs[4 * l][...]          # bf16 [Fin, H]
        b1 = param_refs[4 * l + 1][...]      # f32  [1, H]
        w2 = param_refs[4 * l + 2][...]      # bf16 [H, H]
        b2 = param_refs[4 * l + 3][...]      # f32  [1, H]

        # GIN aggregation: one full-width MXU matmul (combine already folded
        # into the block-diagonal adjacency).
        agg = jnp.dot(adj, h, preferred_element_type=jnp.float32)   # [BtN, Fin] f32

        # 2-layer MLP over all Bt*N node rows at once (fills the MXU M dim).
        h1 = jnp.dot(agg.astype(jnp.bfloat16), w1,
                     preferred_element_type=jnp.float32)
        h1 = jnp.maximum(h1 + b1, 0.0)                               # f32 [BtN, H]
        h2 = jnp.dot(h1.astype(jnp.bfloat16), w2,
                     preferred_element_type=jnp.float32)
        h2 = jnp.maximum(h2 + b2, 0.0)                               # f32 [BtN, H]

        # Next-layer input: VMEM-resident only, never written back to HBM.
        h = h2.astype(jnp.bfloat16)

        # Per-graph sum-pool readout on the MXU.
        pooled.append(jnp.dot(pool, h, preferred_element_type=jnp.float32))  # [Bt, H]

    z_block = jnp.concatenate(pooled, axis=-1)                       # [Bt, L*H] f32
    pad = out_width - num_layers * H
    if pad > 0:
        z_block = jnp.concatenate(
            [z_block, jnp.zeros((Bt, pad), jnp.float32)], axis=-1)
    z_ref[...] = z_block                                             # single lane-dense store


def _default_mxu_rows():
    """Target MXU M-rows per grid step: 128 on v5e and earlier, 256 on v6e/v7x."""
    try:
        kind = jax.devices()[0].device_kind.lower()
    except Exception:
        return 128
    if "v2" in kind or "v3" in kind or "v4" in kind or "v5" in kind:
        return 128
    return 256


def _pick_graphs_per_block(B, N, target_rows, min_grid=2):
    """Largest Bt dividing B with Bt*N <= target_rows, preferring grid >= min_grid.

    Always returns a divisor of B so no full-batch jnp.pad copy is needed.
    """
    max_bt = max(1, min(target_rows // max(N, 1), B))
    best = None
    for bt in range(max_bt, 0, -1):
        if B % bt == 0:
            if best is None:
                best = bt
            if B // bt >= min_grid:
                return bt
    return best if best is not None else 1


def ocgin_forward(x, adj, params, hidden_dim, num_layers, *, eps=0.0,
                  graphs_per_block=None):
    """OCGIN.forward: returns [z, center].

    z      : [B, hidden_dim * num_layers]  concatenated per-layer sum-pool readouts
    center : [1, hidden_dim * num_layers]  fixed zeros (as in __init__)
    """
    B, N, F = x.shape
    H = hidden_dim
    L = num_layers

    if graphs_per_block is None:
        graphs_per_block = _pick_graphs_per_block(B, N, _default_mxu_rows())
    Bt = graphs_per_block
    assert B % Bt == 0, "graphs_per_block must divide the batch"
    NB = B // Bt
    BtN = Bt * N

    # Fold the GIN (1+eps)*x self term into the adjacency diagonal, then pack
    # each block of Bt graphs into ONE block-diagonal [Bt*N, Bt*N] matrix so the
    # per-layer aggregation is a single lane-dense MXU matmul (bf16 is exact for
    # binary adjacency entries).
    adj_hat = adj + (1.0 + eps) * jnp.eye(N, dtype=adj.dtype)[None]
    adj_blk = adj_hat.reshape(NB, Bt, N, N)
    eye_bt = jnp.eye(Bt, dtype=adj_hat.dtype)
    adj_bd = (adj_blk[:, :, :, None, :] * eye_bt[None, :, None, :, None]
              ).reshape(NB * BtN, BtN).astype(jnp.bfloat16)

    # Node features packed row-wise per block; kernel never reshapes.
    x_flat = x.reshape(NB * BtN, F).astype(jnp.bfloat16)

    # Constant sum-pool selector, DMA'd once and resident for the whole grid.
    pool_mat = (jnp.arange(Bt)[:, None]
                == (jnp.arange(BtN)[None, :] // N)).astype(jnp.bfloat16)

    LH = L * H
    out_width = pl.cdiv(LH, 128) * 128              # lane-dense padded output slab

    flat_params = []
    for (w1, b1, w2, b2) in params:
        flat_params += [w1.astype(jnp.bfloat16), b1.astype(jnp.float32),
                        w2.astype(jnp.bfloat16), b2.astype(jnp.float32)]
    param_specs = [pl.BlockSpec(p.shape, lambda g: (0, 0)) for p in flat_params]

    z_pad = pl.pallas_call(
        _ocgin_fused_kernel,
        out_shape=jax.ShapeDtypeStruct((B, out_width), jnp.float32),
        grid_spec=pltpu.PrefetchScalarGridSpec(
            num_scalar_prefetch=0,
            grid=(NB,),
            in_specs=[
                pl.BlockSpec((BtN, F), lambda g: (g, 0)),     # node features
                pl.BlockSpec((BtN, BtN), lambda g: (g, 0)),   # block-diag adjacency
                pl.BlockSpec((Bt, BtN), lambda g: (0, 0)),    # pool selector (constant)
            ] + param_specs,
            out_specs=pl.BlockSpec((Bt, out_width), lambda g: (g, 0)),
        ),
        compiler_params=pltpu.CompilerParams(
            dimension_semantics=("parallel",)),
    )(x_flat, adj_bd, pool_mat, *flat_params)

    z = z_pad[:, :LH]
    center = jnp.zeros((1, LH), jnp.float32)
    return [z, center]


def _ocgin_reference(x, adj, params, eps=0.0):
    """Pure-JAX f32 reference of the same forward pass."""
    _, N, _ = x.shape
    adj_hat = adj + (1.0 + eps) * jnp.eye(N, dtype=adj.dtype)[None]
    h = x
    outs = []
    for (w1, b1, w2, b2) in params:
        agg = jnp.einsum('bij,bjf->bif', adj_hat, h)
        h1 = jnp.maximum(agg @ w1 + b1, 0.0)
        h2 = jnp.maximum(h1 @ w2 + b2, 0.0)
        outs.append(jnp.sum(h2, axis=1))
        h = h2
    return jnp.concatenate(outs, axis=-1)


def init_params(key, dim_features, hidden_dim, num_layers):
    """Deterministic (PRNGKey-seeded) GIN parameters."""
    params = []
    fin = dim_features
    for _ in range(num_layers):
        key, k1, k2 = jax.random.split(key, 3)
        scale1 = 1.0 / jnp.sqrt(jnp.float32(fin))
        scale2 = 1.0 / jnp.sqrt(jnp.float32(hidden_dim))
        w1 = jax.random.uniform(k1, (fin, hidden_dim), jnp.float32,
                                -scale1, scale1)
        b1 = jnp.zeros((1, hidden_dim), jnp.float32)
        w2 = jax.random.uniform(k2, (hidden_dim, hidden_dim), jnp.float32,
                                -scale2, scale2)
        b2 = jnp.zeros((1, hidden_dim), jnp.float32)
        params.append((w1, b1, w2, b2))
        fin = hidden_dim
    return params


if __name__ == "__main__":
    # Small, module-consistent shapes. B=16, N=16 -> Bt=8 graphs per grid step
    # (128 flat MXU rows), grid length 2 (keeps both v7x TensorCores busy).
    B = 16             # graphs in the batch
    N = 16             # nodes per graph (dense padding)
    dim_features = 8   # input node feature dim
    hidden_dim = 32    # args.hidden_dim
    num_layers = 3     # args.num_layer

    key = jax.random.PRNGKey(0)
    kx, ka, kp = jax.random.split(key, 3)

    x = jax.random.normal(kx, (B, N, dim_features), jnp.float32)
    # Random symmetric 0/1 adjacency (no self loops).
    a_raw = jax.random.uniform(ka, (B, N, N))
    adj = (a_raw > 0.7).astype(jnp.float32)
    adj = jnp.maximum(adj, jnp.swapaxes(adj, -1, -2))
    adj = adj * (1.0 - jnp.eye(N, dtype=jnp.float32)[None])

    params = init_params(kp, dim_features, hidden_dim, num_layers)

    z, center = ocgin_forward(x, adj, params, hidden_dim, num_layers)
    jax.block_until_ready(z)
    jax.block_until_ready(center)

    assert z.shape == (B, hidden_dim * num_layers)
    assert center.shape == (1, hidden_dim * num_layers)

    # Numerical check vs a pure-JAX f32 reference (bf16 matmul inputs -> loose tol).
    z_ref = _ocgin_reference(x, adj, params)
    rel_err = float(jnp.max(jnp.abs(z - z_ref)) /
                    (jnp.max(jnp.abs(z_ref)) + 1e-6))
    assert rel_err < 5e-2, f"reference mismatch: rel_err={rel_err}"

    print("KERNEL_OK")
</pallas_src>

<mosaic_0001>
module attributes {stable_mosaic.version = 11 : i64} {
  func.func @_ocgin_fused_kernel(%arg0: i32, %arg1: memref<128x8xbf16, #tpu.memory_space<vmem>>, %arg2: memref<128x128xbf16, #tpu.memory_space<vmem>>, %arg3: memref<8x128xbf16, #tpu.memory_space<vmem>>, %arg4: memref<8x32xbf16, #tpu.memory_space<vmem>>, %arg5: memref<1x32xf32, #tpu.memory_space<vmem>>, %arg6: memref<32x32xbf16, #tpu.memory_space<vmem>>, %arg7: memref<1x32xf32, #tpu.memory_space<vmem>>, %arg8: memref<32x32xbf16, #tpu.memory_space<vmem>>, %arg9: memref<1x32xf32, #tpu.memory_space<vmem>>, %arg10: memref<32x32xbf16, #tpu.memory_space<vmem>>, %arg11: memref<1x32xf32, #tpu.memory_space<vmem>>, %arg12: memref<32x32xbf16, #tpu.memory_space<vmem>>, %arg13: memref<1x32xf32, #tpu.memory_space<vmem>>, %arg14: memref<32x32xbf16, #tpu.memory_space<vmem>>, %arg15: memref<1x32xf32, #tpu.memory_space<vmem>>, %arg16: memref<8x128xf32, #tpu.memory_space<vmem>>) attributes {dimension_semantics = [#tpu.dimension_semantics<parallel>], iteration_bounds = array<i64: 2>, scalar_prefetch = 0 : i64, scratch_operands = 0 : i64, tpu.core_type = #tpu.core_type<tc>, window_params = [{transform_indices = @transform_0, window_bounds = array<i64: 128, 8>}, {transform_indices = @transform_1, window_bounds = array<i64: 128, 128>}, {pipeline_mode = #tpu.pipeline_mode<synchronous>, transform_indices = @transform_2, window_bounds = array<i64: 8, 128>}, {pipeline_mode = #tpu.pipeline_mode<synchronous>, transform_indices = @transform_3, window_bounds = array<i64: 8, 32>}, {pipeline_mode = #tpu.pipeline_mode<synchronous>, transform_indices = @transform_4, window_bounds = array<i64: 1, 32>}, {pipeline_mode = #tpu.pipeline_mode<synchronous>, transform_indices = @transform_5, window_bounds = array<i64: 32, 32>}, {pipeline_mode = #tpu.pipeline_mode<synchronous>, transform_indices = @transform_6, window_bounds = array<i64: 1, 32>}, {pipeline_mode = #tpu.pipeline_mode<synchronous>, transform_indices = @transform_7, window_bounds = array<i64: 32, 32>}, {pipeline_mode = #tpu.pipeline_mode<synchronous>, transform_indices = @transform_8, window_bounds = array<i64: 1, 32>}, {pipeline_mode = #tpu.pipeline_mode<synchronous>, transform_indices = @transform_9, window_bounds = array<i64: 32, 32>}, {pipeline_mode = #tpu.pipeline_mode<synchronous>, transform_indices = @transform_10, window_bounds = array<i64: 1, 32>}, {pipeline_mode = #tpu.pipeline_mode<synchronous>, transform_indices = @transform_11, window_bounds = array<i64: 32, 32>}, {pipeline_mode = #tpu.pipeline_mode<synchronous>, transform_indices = @transform_12, window_bounds = array<i64: 1, 32>}, {pipeline_mode = #tpu.pipeline_mode<synchronous>, transform_indices = @transform_13, window_bounds = array<i64: 32, 32>}, {pipeline_mode = #tpu.pipeline_mode<synchronous>, transform_indices = @transform_14, window_bounds = array<i64: 1, 32>}, {transform_indices = @transform_15, window_bounds = array<i64: 8, 128>}]} {
    %c0 = arith.constant 0 : index
    %c0_0 = arith.constant 0 : index
    %0 = vector.load %arg2[%c0, %c0_0] : memref<128x128xbf16, #tpu.memory_space<vmem>>, vector<128x128xbf16>
    %c0_1 = arith.constant 0 : index
    %c0_2 = arith.constant 0 : index
    %1 = vector.load %arg3[%c0_1, %c0_2] : memref<8x128xbf16, #tpu.memory_space<vmem>>, vector<8x128xbf16>
    %c0_3 = arith.constant 0 : index
    %c0_4 = arith.constant 0 : index
    %2 = vector.load %arg1[%c0_3, %c0_4] : memref<128x8xbf16, #tpu.memory_space<vmem>>, vector<128x8xbf16>
    %c0_5 = arith.constant 0 : index
    %c0_6 = arith.constant 0 : index
    %3 = vector.load %arg4[%c0_5, %c0_6] : memref<8x32xbf16, #tpu.memory_space<vmem>>, vector<8x32xbf16>
    %c0_7 = arith.constant 0 : index
    %c0_8 = arith.constant 0 : index
    %4 = vector.load %arg5[%c0_7, %c0_8] : memref<1x32xf32, #tpu.memory_space<vmem>>, vector<1x32xf32>
    %c0_9 = arith.constant 0 : index
    %c0_10 = arith.constant 0 : index
    %5 = vector.load %arg6[%c0_9, %c0_10] : memref<32x32xbf16, #tpu.memory_space<vmem>>, vector<32x32xbf16>
    %c0_11 = arith.constant 0 : index
    %c0_12 = arith.constant 0 : index
    %6 = vector.load %arg7[%c0_11, %c0_12] : memref<1x32xf32, #tpu.memory_space<vmem>>, vector<1x32xf32>
    %cst = arith.constant dense<0.000000e+00> : vector<128x8xf32>
    %7 = tpu.matmul %0, %2, %cst {dimension_numbers = #tpu.dot_dimension_numbers<[1], [0], [0], [1], [0, 0, 1, 1], [], []>} : vector<128x128xbf16>, vector<128x8xbf16>, vector<128x8xf32> -> vector<128x8xf32>
    %8 = arith.truncf %7 : vector<128x8xf32> to vector<128x8xbf16>
    %cst_13 = arith.constant dense<0.000000e+00> : vector<128x32xf32>
    %9 = tpu.matmul %8, %3, %cst_13 {dimension_numbers = #tpu.dot_dimension_numbers<[1], [0], [0], [1], [0, 0, 1, 1], [], []>} : vector<128x8xbf16>, vector<8x32xbf16>, vector<128x32xf32> -> vector<128x32xf32>
    %10 = vector.broadcast %4 : vector<1x32xf32> to vector<128x32xf32>
    %11 = arith.addf %9, %10 : vector<128x32xf32>
    %cst_14 = arith.constant 0.000000e+00 : f32
    %12 = vector.broadcast %cst_14 : f32 to vector<128x32xf32>
    %13 = arith.maximumf %11, %12 : vector<128x32xf32>
    %14 = arith.truncf %13 : vector<128x32xf32> to vector<128x32xbf16>
    %cst_15 = arith.constant dense<0.000000e+00> : vector<128x32xf32>
    %15 = tpu.matmul %14, %5, %cst_15 {dimension_numbers = #tpu.dot_dimension_numbers<[1], [0], [0], [1], [0, 0, 1, 1], [], []>} : vector<128x32xbf16>, vector<32x32xbf16>, vector<128x32xf32> -> vector<128x32xf32>
    %16 = vector.broadcast %6 : vector<1x32xf32> to vector<128x32xf32>
    %17 = arith.addf %15, %16 : vector<128x32xf32>
    %cst_16 = arith.constant 0.000000e+00 : f32
    %18 = vector.broadcast %cst_16 : f32 to vector<128x32xf32>
    %19 = arith.maximumf %17, %18 : vector<128x32xf32>
    %20 = arith.truncf %19 : vector<128x32xf32> to vector<128x32xbf16>
    %cst_17 = arith.constant dense<0.000000e+00> : vector<8x32xf32>
    %21 = tpu.matmul %1, %20, %cst_17 {dimension_numbers = #tpu.dot_dimension_numbers<[1], [0], [0], [1], [0, 0, 1, 1], [], []>} : vector<8x128xbf16>, vector<128x32xbf16>, vector<8x32xf32> -> vector<8x32xf32>
    %c0_18 = arith.constant 0 : index
    %c0_19 = arith.constant 0 : index
    %22 = vector.load %arg8[%c0_18, %c0_19] : memref<32x32xbf16, #tpu.memory_space<vmem>>, vector<32x32xbf16>
    %c0_20 = arith.constant 0 : index
    %c0_21 = arith.constant 0 : index
    %23 = vector.load %arg9[%c0_20, %c0_21] : memref<1x32xf32, #tpu.memory_space<vmem>>, vector<1x32xf32>
    %c0_22 = arith.constant 0 : index
    %c0_23 = arith.constant 0 : index
    %24 = vector.load %arg10[%c0_22, %c0_23] : memref<32x32xbf16, #tpu.memory_space<vmem>>, vector<32x32xbf16>
    %c0_24 = arith.constant 0 : index
    %c0_25 = arith.constant 0 : index
    %25 = vector.load %arg11[%c0_24, %c0_25] : memref<1x32xf32, #tpu.memory_space<vmem>>, vector<1x32xf32>
    %cst_26 = arith.constant dense<0.000000e+00> : vector<128x32xf32>
    %26 = tpu.matmul %0, %20, %cst_26 {dimension_numbers = #tpu.dot_dimension_numbers<[1], [0], [0], [1], [0, 0, 1, 1], [], []>} : vector<128x128xbf16>, vector<128x32xbf16>, vector<128x32xf32> -> vector<128x32xf32>
    %27 = arith.truncf %26 : vector<128x32xf32> to vector<128x32xbf16>
    %cst_27 = arith.constant dense<0.000000e+00> : vector<128x32xf32>
    %28 = tpu.matmul %27, %22, %cst_27 {dimension_numbers = #tpu.dot_dimension_numbers<[1], [0], [0], [1], [0, 0, 1, 1], [], []>} : vector<128x32xbf16>, vector<32x32xbf16>, vector<128x32xf32> -> vector<128x32xf32>
    %29 = vector.broadcast %23 : vector<1x32xf32> to vector<128x32xf32>
    %30 = arith.addf %28, %29 : vector<128x32xf32>
    %cst_28 = arith.constant 0.000000e+00 : f32
    %31 = vector.broadcast %cst_28 : f32 to vector<128x32xf32>
    %32 = arith.maximumf %30, %31 : vector<128x32xf32>
    %33 = arith.truncf %32 : vector<128x32xf32> to vector<128x32xbf16>
    %cst_29 = arith.constant dense<0.000000e+00> : vector<128x32xf32>
    %34 = tpu.matmul %33, %24, %cst_29 {dimension_numbers = #tpu.dot_dimension_numbers<[1], [0], [0], [1], [0, 0, 1, 1], [], []>} : vector<128x32xbf16>, vector<32x32xbf16>, vector<128x32xf32> -> vector<128x32xf32>
    %35 = vector.broadcast %25 : vector<1x32xf32> to vector<128x32xf32>
    %36 = arith.addf %34, %35 : vector<128x32xf32>
    %cst_30 = arith.constant 0.000000e+00 : f32
    %37 = vector.broadcast %cst_30 : f32 to vector<128x32xf32>
    %38 = arith.maximumf %36, %37 : vector<128x32xf32>
    %39 = arith.truncf %38 : vector<128x32xf32> to vector<128x32xbf16>
    %cst_31 = arith.constant dense<0.000000e+00> : vector<8x32xf32>
    %40 = tpu.matmul %1, %39, %cst_31 {dimension_numbers = #tpu.dot_dimension_numbers<[1], [0], [0], [1], [0, 0, 1, 1], [], []>} : vector<8x128xbf16>, vector<128x32xbf16>, vector<8x32xf32> -> vector<8x32xf32>
    %c0_32 = arith.constant 0 : index
    %c0_33 = arith.constant 0 : index
    %41 = vector.load %arg12[%c0_32, %c0_33] : memref<32x32xbf16, #tpu.memory_space<vmem>>, vector<32x32xbf16>
    %c0_34 = arith.constant 0 : index
    %c0_35 = arith.constant 0 : index
    %42 = vector.load %arg13[%c0_34, %c0_35] : memref<1x32xf32, #tpu.memory_space<vmem>>, vector<1x32xf32>
    %c0_36 = arith.constant 0 : index
    %c0_37 = arith.constant 0 : index
    %43 = vector.load %arg14[%c0_36, %c0_37] : memref<32x32xbf16, #tpu.memory_space<vmem>>, vector<32x32xbf16>
    %c0_38 = arith.constant 0 : index
    %c0_39 = arith.constant 0 : index
    %44 = vector.load %arg15[%c0_38, %c0_39] : memref<1x32xf32, #tpu.memory_space<vmem>>, vector<1x32xf32>
    %cst_40 = arith.constant dense<0.000000e+00> : vector<128x32xf32>
    %45 = tpu.matmul %0, %39, %cst_40 {dimension_numbers = #tpu.dot_dimension_numbers<[1], [0], [0], [1], [0, 0, 1, 1], [], []>} : vector<128x128xbf16>, vector<128x32xbf16>, vector<128x32xf32> -> vector<128x32xf32>
    %46 = arith.truncf %45 : vector<128x32xf32> to vector<128x32xbf16>
    %cst_41 = arith.constant dense<0.000000e+00> : vector<128x32xf32>
    %47 = tpu.matmul %46, %41, %cst_41 {dimension_numbers = #tpu.dot_dimension_numbers<[1], [0], [0], [1], [0, 0, 1, 1], [], []>} : vector<128x32xbf16>, vector<32x32xbf16>, vector<128x32xf32> -> vector<128x32xf32>
    %48 = vector.broadcast %42 : vector<1x32xf32> to vector<128x32xf32>
    %49 = arith.addf %47, %48 : vector<128x32xf32>
    %cst_42 = arith.constant 0.000000e+00 : f32
    %50 = vector.broadcast %cst_42 : f32 to vector<128x32xf32>
    %51 = arith.maximumf %49, %50 : vector<128x32xf32>
    %52 = arith.truncf %51 : vector<128x32xf32> to vector<128x32xbf16>
    %cst_43 = arith.constant dense<0.000000e+00> : vector<128x32xf32>
    %53 = tpu.matmul %52, %43, %cst_43 {dimension_numbers = #tpu.dot_dimension_numbers<[1], [0], [0], [1], [0, 0, 1, 1], [], []>} : vector<128x32xbf16>, vector<32x32xbf16>, vector<128x32xf32> -> vector<128x32xf32>
    %54 = vector.broadcast %44 : vector<1x32xf32> to vector<128x32xf32>
    %55 = arith.addf %53, %54 : vector<128x32xf32>
    %cst_44 = arith.constant 0.000000e+00 : f32
    %56 = vector.broadcast %cst_44 : f32 to vector<128x32xf32>
    %57 = arith.maximumf %55, %56 : vector<128x32xf32>
    %58 = arith.truncf %57 : vector<128x32xf32> to vector<128x32xbf16>
    %cst_45 = arith.constant dense<0.000000e+00> : vector<8x32xf32>
    %59 = tpu.matmul %1, %58, %cst_45 {dimension_numbers = #tpu.dot_dimension_numbers<[1], [0], [0], [1], [0, 0, 1, 1], [], []>} : vector<8x128xbf16>, vector<128x32xbf16>, vector<8x32xf32> -> vector<8x32xf32>
    %60 = tpu.concatenate %21, %40, %59 in 1 : vector<8x32xf32>, vector<8x32xf32>, vector<8x32xf32> -> vector<8x96xf32>
    %cst_46 = arith.constant 0.000000e+00 : f32
    %61 = vector.broadcast %cst_46 : f32 to vector<8x32xf32>
    %62 = tpu.concatenate %60, %61 in 1 : vector<8x96xf32>, vector<8x32xf32> -> vector<8x128xf32>
    %c0_47 = arith.constant 0 : index
    %c0_48 = arith.constant 0 : index
    %63 = vector.load %arg16[%c0_47, %c0_48] : memref<8x128xf32, #tpu.memory_space<vmem>>, vector<8x128xf32>
    tpu.vector_store %arg16[%c0_47, %c0_48], %62 {strides = array<i32>} : memref<8x128xf32, #tpu.memory_space<vmem>>, vector<8x128xf32>,
    return
  }
  func.func @transform_0(%arg0: i32) -> (i32, i32) {
    %c0_i32 = arith.constant 0 : i32
    %c0_i32_0 = arith.constant 0 : i32
    return %arg0, %c0_i32 : i32, i32
  }
  func.func @transform_1(%arg0: i32) -> (i32, i32) {
    %c0_i32 = arith.constant 0 : i32
    %c0_i32_0 = arith.constant 0 : i32
    return %arg0, %c0_i32 : i32, i32
  }
  func.func @transform_2(%arg0: i32) -> (i32, i32) {
    %c0_i32 = arith.constant 0 : i32
    %c0_i32_0 = arith.constant 0 : i32
    %c0_i32_1 = arith.constant 0 : i32
    return %c0_i32, %c0_i32_0 : i32, i32
  }
  func.func @transform_3(%arg0: i32) -> (i32, i32) {
    %c0_i32 = arith.constant 0 : i32
    %c0_i32_0 = arith.constant 0 : i32
    %c0_i32_1 = arith.constant 0 : i32
    return %c0_i32, %c0_i32_0 : i32, i32
  }
  func.func @transform_4(%arg0: i32) -> (i32, i32) {
    %c0_i32 = arith.constant 0 : i32
    %c0_i32_0 = arith.constant 0 : i32
    %c0_i32_1 = arith.constant 0 : i32
    return %c0_i32, %c0_i32_0 : i32, i32
  }
  func.func @transform_5(%arg0: i32) -> (i32, i32) {
    %c0_i32 = arith.constant 0 : i32
    %c0_i32_0 = arith.constant 0 : i32
    %c0_i32_1 = arith.constant 0 : i32
    return %c0_i32, %c0_i32_0 : i32, i32
  }
  func.func @transform_6(%arg0: i32) -> (i32, i32) {
    %c0_i32 = arith.constant 0 : i32
    %c0_i32_0 = arith.constant 0 : i32
    %c0_i32_1 = arith.constant 0 : i32
    return %c0_i32, %c0_i32_0 : i32, i32
  }
  func.func @transform_7(%arg0: i32) -> (i32, i32) {
    %c0_i32 = arith.constant 0 : i32
    %c0_i32_0 = arith.constant 0 : i32
    %c0_i32_1 = arith.constant 0 : i32
    return %c0_i32, %c0_i32_0 : i32, i32
  }
  func.func @transform_8(%arg0: i32) -> (i32, i32) {
    %c0_i32 = arith.constant 0 : i32
    %c0_i32_0 = arith.constant 0 : i32
    %c0_i32_1 = arith.constant 0 : i32
    return %c0_i32, %c0_i32_0 : i32, i32
  }
  func.func @transform_9(%arg0: i32) -> (i32, i32) {
    %c0_i32 = arith.constant 0 : i32
    %c0_i32_0 = arith.constant 0 : i32
    %c0_i32_1 = arith.constant 0 : i32
    return %c0_i32, %c0_i32_0 : i32, i32
  }
  func.func @transform_10(%arg0: i32) -> (i32, i32) {
    %c0_i32 = arith.constant 0 : i32
    %c0_i32_0 = arith.constant 0 : i32
    %c0_i32_1 = arith.constant 0 : i32
    return %c0_i32, %c0_i32_0 : i32, i32
  }
  func.func @transform_11(%arg0: i32) -> (i32, i32) {
    %c0_i32 = arith.constant 0 : i32
    %c0_i32_0 = arith.constant 0 : i32
    %c0_i32_1 = arith.constant 0 : i32
    return %c0_i32, %c0_i32_0 : i32, i32
  }
  func.func @transform_12(%arg0: i32) -> (i32, i32) {
    %c0_i32 = arith.constant 0 : i32
    %c0_i32_0 = arith.constant 0 : i32
    %c0_i32_1 = arith.constant 0 : i32
    return %c0_i32, %c0_i32_0 : i32, i32
  }
  func.func @transform_13(%arg0: i32) -> (i32, i32) {
    %c0_i32 = arith.constant 0 : i32
    %c0_i32_0 = arith.constant 0 : i32
    %c0_i32_1 = arith.constant 0 : i32
    return %c0_i32, %c0_i32_0 : i32, i32
  }
  func.func @transform_14(%arg0: i32) -> (i32, i32) {
    %c0_i32 = arith.constant 0 : i32
    %c0_i32_0 = arith.constant 0 : i32
    %c0_i32_1 = arith.constant 0 : i32
    return %c0_i32, %c0_i32_0 : i32, i32
  }
  func.func @transform_15(%arg0: i32) -> (i32, i32) {
    %c0_i32 = arith.constant 0 : i32
    %c0_i32_0 = arith.constant 0 : i32
    return %arg0, %c0_i32 : i32, i32
  }
}

</mosaic_0001>

<bundles_post_ra>
// kernel: tpu_custom_call.1
= control target key start
LH: loop header
LB: loop body
LE: loop exit
PB: predicated region body
PF: predicated region fallthrough
CT: control target
= control target key end

     0   :  { %s3850_s0 = inlined_call_operand.vmem [shape: bf16[256,8], index: 0, kind: input, shape index: {}]   ;;  %s3851_s1 = inlined_call_operand.vmem [shape: bf16[256,128], index: 1, kind: input, shape index: {}]   ;;  %s3852_s2 = inlined_call_operand.hbm [shape: bf16[8,128], index: 2, kind: input, shape index: {}]   ;;  %s3853_s3 = inlined_call_operand.hbm [shape: bf16[8,32], index: 3, kind: input, shape index: {}]   ;;  %s3854_s4 = inlined_call_operand.vmem [shape: f32[1,32], index: 4, kind: input, shape index: {}]   ;;  %s3855_s5 = inlined_call_operand.vmem [shape: bf16[32,32], index: 5, kind: input, shape index: {}]   ;;  %s3856_s6 = inlined_call_operand.hbm [shape: f32[1,32], index: 6, kind: input, shape index: {}]   ;;  %s3857_s7 = inlined_call_operand.vmem [shape: bf16[32,32], index: 7, kind: input, shape index: {}]   ;;  %s3858_s8 = inlined_call_operand.hbm [shape: f32[1,32], index: 8, kind: input, shape index: {}]   ;;  %s3859_s9 = inlined_call_operand.hbm [shape: bf16[32,32], index: 9, kind: input, shape index: {}]   ;;  %s3860_s10 = inlined_call_operand.hbm [shape: f32[1,32], index: 10, kind: input, shape index: {}]   ;;  %s3861_s11 = inlined_call_operand.vmem [shape: bf16[32,32], index: 11, kind: input, shape index: {}]   ;;  %s3862_s12 = inlined_call_operand.vmem [shape: f32[1,32], index: 12, kind: input, shape index: {}]   ;;  %s3863_s13 = inlined_call_operand.hbm [shape: bf16[32,32], index: 13, kind: input, shape index: {}]   ;;  %s3864_s14 = inlined_call_operand.vmem [shape: f32[1,32], index: 14, kind: input, shape index: {}]   ;;  %s3865_s15 = inlined_call_operand.hbm [shape: f32[16,128], index: 15, kind: output, shape index: {}]  }
   0x1   :  { %3879 = sst [smem:[#allocation28_spill]] %s3852_s2 }
   0x2   :  { %3880 = sst [smem:[#allocation29_spill]] %s3853_s3 }
   0x3   :  { %3881 = sst [smem:[#allocation30_spill]] %s3865_s15 }
   0x4   :  { %20 = vsyncpa [#allocation3], 0 }
   0x5   :  { %21 = vsyncpa [#allocation6], 0 }
   0x6   :  { %22 = vsyncpa [#allocation9], 0 }
   0x7   :  { %23 = vsyncpa [#allocation12], 0 }
   0x8   :  { %24 = vsyncpa [#allocation4], 0 }
   0x9   :  { %26 = vsyncpa [#allocation4 + $0x1], 0  ;;  %s3369_s18 = smov 0   ;;  %s3371_s19 = smov 0  }
   0xa   :  { %s3373_s20 = smov 0   ;;  %s3375_s21 = smov 0  }
   0xb LB: > { %3882 = sst [smem:[#allocation20_spill]] %s3261_s18  ;;  %s3390_s22 = sadd.s32 4294967295, %s3273_s21   ;;  %s3273_s21 = sphi %s3375_s21, %s3914_s21   ;;  %s3269_s20 = sphi %s3373_s20, %s3917_s20   ;;  %s3265_s19 = sphi %s3371_s19, %s3916_s19   ;;  %s3261_s18 = sphi %s3369_s18, %s3915_s18  }
   0xc   : > { %3883 = sst [smem:[#allocation21_spill]] %s3265_s19  ;;  %s2341_s23 = sadd.s32 4294967294, %s3273_s21  }
   0xd   : > { %3884 = sst [smem:[#allocation22_spill]] %s3269_s20  ;;  %s3394_s24 = sadd.s32 1, %s3273_s21  }
   0xe   : > { %3885 = sst [smem:[#allocation23_spill]] %s3273_s21  ;;  %s364_s25 = sadd.s32 1, %s3269_s20 }
   0xf   : > { %3886 = sst [smem:[#allocation24_spill]] %s3394_s24  ;;  %s361_s26 = ssub.s32 %s3273_s21, %s3394_s24 }
  0x10   : > { %p374_p0 = scmp.ne.s32.totalorder %s3269_s20, %s3265_s19  ;;  %p362_p1 = scmp.eq.s32.totalorder %s361_s26, 0 }
  0x11   : > { %p375_p2 = scmp.eq.s32.totalorder %s3390_s22, 1  ;;  %p380_p3 = scmp.ne.s32.totalorder %s3265_s19, %s3261_s18 }
  0x12   : > { %p381_p4 = scmp.eq.s32.totalorder %s2341_s23, 1  ;;  %p2342_p7 = scmp.ge.s32.totalorder %s3273_s21, 1 }
  0x13   : > { %s3405_s27 = scalar_select %p362_p1, %s3269_s20, %s364_s25  }
  0x14   : > { %p3407_p5 = por %p375_p2, %p374_p0  ;;  %p3411_p6 = por %p381_p4, %p380_p3 }
  0x15   : > { %3887 = sst [smem:[#allocation25_spill]] %s3405_s27  ;;  %p388_p8 = scmp.lt.s32.totalorder %s3273_s21, 3 }
  0x16   : > { %s3888_s28 = scalar_select %p3407_p5, 1, 0 }
  0x17   : > { %s3890_s29 = scalar_select %p3411_p6, 1, 0 }
  0x18   : > { %3889 = sst [smem:[#allocation26_spill]] %s3888_s28  ;;  %p3873_p9 = scmp.eq.s32.totalorder %s3390_s22, 0 }
  0x19   : > { %3891 = sst [smem:[#allocation27_spill]] %s3890_s29  ;;  %p3418_p10 = pnand %p2342_p7, %p388_p8 }
  0x1a   : > { %s3275_s16 = smov [#allocation5]   ;;  %s3276_s23 = smov [#allocation8]  }
  0x1b   : > { %s3892_s30 = scalar_select %p3418_p10, 1, 0 }
  0x1c   : > { %s412_s17 = sshll.u32 %s3275_s16, 4  ;;  %p2887_p11 = pneg %p3418_p10  ;;  %s413_s17 = int_to_ptr.vmem [resolvable:$true] %s412_s17 }
  0x1d   : > { %s443_s25 = sshll.u32 %s3276_s23, 4  ;;  %s3277_s27 = smov [#allocation11]   ;;  %s3430_s25 = int_to_ptr.vmem [resolvable:$true] %s443_s25 }
  0x1e   : > { %p3426_p12 = pnand %p3873_p9, %p2887_p11  ;;  %s467_s20 = sshll.u32 %s3277_s27, 4  ;;  %s3432_s20 = int_to_ptr.vmem [resolvable:$true] %s467_s20 }
  0x1f   : > { %s3894_s3 = sld [smem:[#allocation29_spill]] }
  0x20   : > { %p3442_p0 = pneg %p3426_p12 }
  0x25   : > { %s2999_s16 = scalar_lea.hbm %s3894_s3, 64 }
  0x26   : > { %p3000_p13 = scmp.ne.s32.totalorder %s3894_s3, %s2999_s16  ;;  %p3006_p3 = scmp.lt.u32.totalorder %s2999_s16, %s3894_s3 }
  0x28   : > { %p3002_p1 = pnand %p3442_p0, %p3000_p13 }
  0x2a   : > { %p3003_p2 = pneg %p3002_p1 }
  0x2c   : > { %p3008_p4 = pnand %p3006_p3, %p3003_p2 }
  0x2e   : > { %3011 = shalt.err (!%p3008_p4)
}
  0x2f   : > { %s3012_s24 = scalar_lea.vmem %s413_s17, 64  ;;  %p3020_p9 = scmp.lt.s32.totalorder %s413_s17, %s413_s17 }
  0x30   : > { %p3013_p7 = scmp.ne.s32.totalorder %s413_s17, %s3012_s24  ;;  %p3021_p6 = scmp.lt.s32.totalorder %s3012_s24, %s3012_s24 }
  0x32   : > { %p3015_p8 = pnand %p3013_p7, %p3442_p0  ;;  %p3022_p5 = por %p3021_p6, %p3020_p9 }
  0x34   : > { %p3016_p11 = pneg %p3015_p8 }
  0x36   : > { %p3023_p10 = pnand %p3022_p5, %p3016_p11 }
  0x38   : > { %3026 = shalt.err (!%p3023_p10)
}
  0x39   : > { %2893 = dma.hbm_to_vmem [thread:$0]  (!%p3426_p12), %s3894_s3, 64, %s413_s17, [#allocation6]  }
  0x3a   : > { %s3027_s16 = scalar_lea.hbm %s3858_s8, 16 }
  0x3b   : > { %p3028_p13 = scmp.ne.s32.totalorder %s3858_s8, %s3027_s16  ;;  %p3034_p5 = scmp.lt.u32.totalorder %s3027_s16, %s3858_s8 }
  0x3d   : > { %p3030_p1 = pnand %p3028_p13, %p3442_p0 }
  0x3f   : > { %p3031_p6 = pneg %p3030_p1 }
  0x41   : > { %p3036_p9 = pnand %p3034_p5, %p3031_p6 }
  0x43   : > { %3039 = shalt.err (!%p3036_p9)
}
  0x44   : > { %s3040_s17 = scalar_lea.vmem %s3430_s25, 16  ;;  %s3047_s28 = scalar_lea.vmem %s3430_s25, 32 }
  0x45   : > { %p3041_p10 = scmp.ne.s32.totalorder %s3430_s25, %s3040_s17  ;;  %p3048_p4 = scmp.lt.s32.totalorder %s3430_s25, %s3430_s25 }
  0x46   : > { %p3049_p7 = scmp.lt.s32.totalorder %s3047_s28, %s3040_s17 }
  0x47   : > { %p3043_p2 = pnand %p3041_p10, %p3442_p0 }
  0x48   : > { %p3050_p8 = por %p3049_p7, %p3048_p4 }
  0x49   : > { %p3044_p3 = pneg %p3043_p2 }
  0x4b   : > { %p3051_p11 = pnand %p3050_p8, %p3044_p3 }
  0x4d   : > { %3054 = shalt.err (!%p3051_p11)
}
  0x4e   : > { %2899 = dma.hbm_to_vmem [thread:$0]  (!%p3426_p12), %s3858_s8, 16, %s3430_s25, [#allocation9]  }
  0x4f   : > { %s3055_s29 = scalar_lea.hbm %s3860_s10, 16 }
  0x50   : > { %p3056_p13 = scmp.ne.s32.totalorder %s3860_s10, %s3055_s29  ;;  %p3062_p5 = scmp.lt.u32.totalorder %s3055_s29, %s3860_s10 }
  0x52   : > { %p3058_p1 = pnand %p3056_p13, %p3442_p0 }
  0x54   : > { %p3059_p6 = pneg %p3058_p1 }
  0x56   : > { %p3064_p9 = pnand %p3062_p5, %p3059_p6 }
  0x58   : > { %3067 = shalt.err (!%p3064_p9)
}
  0x59   : > { %s3068_s25 = scalar_lea.vmem %s3432_s20, 16  ;;  %s3075_s28 = scalar_lea.vmem %s3432_s20, 32 }
  0x5a   : > { %p3069_p10 = scmp.ne.s32.totalorder %s3432_s20, %s3068_s25  ;;  %p3076_p4 = scmp.lt.s32.totalorder %s3432_s20, %s3432_s20 }
  0x5b   : > { %p3077_p7 = scmp.lt.s32.totalorder %s3075_s28, %s3068_s25 }
  0x5c   : > { %p3071_p2 = pnand %p3069_p10, %p3442_p0 }
  0x5d   : > { %p3078_p8 = por %p3077_p7, %p3076_p4 }
  0x5e   : > { %p3072_p3 = pneg %p3071_p2 }
  0x60   : > { %p3079_p11 = pnand %p3078_p8, %p3072_p3 }
  0x62   : > { %3082 = shalt.err (!%p3079_p11)
}
  0x63   : > { %2905 = dma.hbm_to_vmem [thread:$0]  (!%p3426_p12), %s3860_s10, 16, %s3432_s20, [#allocation12]  }
  0x64   : > { %s3278_s21 = smov [#allocation2]   ;;  %s3279_s29 = smov [#allocation7]  }
  0x65   : > { %s401_s15 = sshll.u32 %s3278_s21, 4  ;;  %s429_s16 = sshll.u32 %s3279_s29, 4  ;;  %s402_s15 = int_to_ptr.vmem [resolvable:$true] %s401_s15  ;;  %s430_s16 = int_to_ptr.vmem [resolvable:$true] %s429_s16 }
  0x66   : > { %s3896_s2 = sld [smem:[#allocation28_spill]] }
  0x6c   : > { %s3083_s17 = scalar_lea.hbm %s3896_s2, 64 }
  0x6d   : > { %p3084_p13 = scmp.ne.s32.totalorder %s3896_s2, %s3083_s17  ;;  %p3090_p5 = scmp.lt.u32.totalorder %s3083_s17, %s3896_s2 }
  0x6f   : > { %p3086_p1 = pnand %p3084_p13, %p3442_p0 }
  0x71   : > { %p3087_p6 = pneg %p3086_p1 }
  0x73   : > { %p3092_p9 = pnand %p3090_p5, %p3087_p6 }
  0x75   : > { %3095 = shalt.err (!%p3092_p9)
}
  0x76   : > { %s3096_s20 = scalar_lea.vmem %s402_s15, 64  ;;  %p3104_p4 = scmp.lt.s32.totalorder %s402_s15, %s402_s15 }
  0x77   : > { %p3097_p10 = scmp.ne.s32.totalorder %s402_s15, %s3096_s20  ;;  %p3105_p7 = scmp.lt.s32.totalorder %s3096_s20, %s3096_s20 }
  0x79   : > { %p3099_p2 = pnand %p3097_p10, %p3442_p0  ;;  %p3106_p8 = por %p3105_p7, %p3104_p4 }
  0x7b   : > { %p3100_p3 = pneg %p3099_p2 }
  0x7d   : > { %p3107_p11 = pnand %p3106_p8, %p3100_p3 }
  0x7f   : > { %3110 = shalt.err (!%p3107_p11)
}
  0x80   : > { %2890 = dma.hbm_to_vmem [thread:$0]  (!%p3426_p12), %s3896_s2, 64, %s402_s15, [#allocation3]  }
  0x81   : > { %s3111_s27 = scalar_lea.hbm %s3856_s6, 16 }
  0x82   : > { %p3112_p13 = scmp.ne.s32.totalorder %s3856_s6, %s3111_s27  ;;  %p3118_p5 = scmp.lt.u32.totalorder %s3111_s27, %s3856_s6 }
  0x84   : > { %p3114_p1 = pnand %p3112_p13, %p3442_p0 }
  0x86   : > { %p3115_p6 = pneg %p3114_p1 }
  0x88   : > { %p3120_p9 = pnand %p3118_p5, %p3115_p6 }
  0x8a   : > { %3123 = shalt.err (!%p3120_p9)
}
  0x8b   : > { %s3124_s19 = scalar_lea.vmem %s430_s16, 16  ;;  %s3131_s15 = scalar_lea.vmem %s430_s16, 32 }
  0x8c   : > { %p3125_p10 = scmp.ne.s32.totalorder %s430_s16, %s3124_s19  ;;  %p3132_p4 = scmp.lt.s32.totalorder %s430_s16, %s430_s16 }
  0x8d   : > { %p3133_p7 = scmp.lt.s32.totalorder %s3131_s15, %s3124_s19 }
  0x8e   : > { %p3127_p2 = pnand %p3125_p10, %p3442_p0 }
  0x8f   : > { %p3134_p8 = por %p3133_p7, %p3132_p4 }
  0x90   : > { %p3128_p3 = pneg %p3127_p2 }
  0x92   : > { %p3135_p11 = pnand %p3134_p8, %p3128_p3 }
  0x94   : > { %3138 = shalt.err (!%p3135_p11)
}
  0x95   : > { %2896 = dma.hbm_to_vmem [thread:$0]  (!%p3426_p12), %s3856_s6, 16, %s430_s16, [#allocation6]  }
  0x96   : > { %s3280_s21 = smov [#allocation10]   ;;  %s3139_s24 = scalar_lea.hbm %s3859_s9, 256 }
  0x97   : > { %s453_s3 = sshll.u32 %s3280_s21, 4  ;;  %p3140_p13 = scmp.ne.s32.totalorder %s3859_s9, %s3139_s24  ;;  %s454_s3 = int_to_ptr.vmem [resolvable:$true] %s453_s3 }
  0x98   : > { %p3146_p5 = scmp.lt.u32.totalorder %s3139_s24, %s3859_s9 }
  0x99   : > { %p3142_p1 = pnand %p3140_p13, %p3442_p0 }
  0x9b   : > { %p3143_p6 = pneg %p3142_p1 }
  0x9d   : > { %p3148_p9 = pnand %p3146_p5, %p3143_p6 }
  0x9f   : > { %3151 = shalt.err (!%p3148_p9)
}
  0xa0   : > { %s3152_s16 = scalar_lea.vmem %s454_s3, 256  ;;  %p3160_p4 = scmp.lt.s32.totalorder %s454_s3, %s454_s3 }
  0xa1   : > { %p3153_p10 = scmp.ne.s32.totalorder %s454_s3, %s3152_s16  ;;  %p3161_p7 = scmp.lt.s32.totalorder %s3152_s16, %s3152_s16 }
  0xa3   : > { %p3155_p2 = pnand %p3153_p10, %p3442_p0  ;;  %p3162_p8 = por %p3161_p7, %p3160_p4 }
  0xa5   : > { %p3156_p3 = pneg %p3155_p2 }
  0xa7   : > { %p3163_p11 = pnand %p3162_p8, %p3156_p3 }
  0xa9   : > { %3166 = shalt.err (!%p3163_p11)
}
  0xaa   : > { %s3281_s15 = smov 64   ;;  %s3282_s20 = smov 4  }
  0xab   : > { %2902 = dma.hbm_to_vmem [thread:$0]  (!%p3426_p12), %s3859_s9, 256, %s454_s3, [#allocation9], %s3281_s15, %s3281_s15, %s3282_s20  }
  0xac   : > { %s3283_s29 = smov [#allocation13]   ;;  %s3167_s25 = scalar_lea.hbm %s3863_s13, 256 }
  0xad   : > { %s483_s27 = sshll.u32 %s3283_s29, 4  ;;  %p3168_p13 = scmp.ne.s32.totalorder %s3863_s13, %s3167_s25  ;;  %s484_s27 = int_to_ptr.vmem [resolvable:$true] %s483_s27 }
  0xae   : > { %p3174_p5 = scmp.lt.u32.totalorder %s3167_s25, %s3863_s13 }
  0xaf   : > { %p3170_p1 = pnand %p3168_p13, %p3442_p0 }
  0xb1   : > { %p3171_p6 = pneg %p3170_p1 }
  0xb3   : > { %p3176_p9 = pnand %p3174_p5, %p3171_p6 }
  0xb5   : > { %3179 = shalt.err (!%p3176_p9)
}
  0xb6   : > { %s3180_s3 = scalar_lea.vmem %s484_s27, 256  ;;  %p3188_p4 = scmp.lt.s32.totalorder %s484_s27, %s484_s27 }
  0xb7   : > { %p3181_p10 = scmp.ne.s32.totalorder %s484_s27, %s3180_s3  ;;  %p3189_p7 = scmp.lt.s32.totalorder %s3180_s3, %s3180_s3 }
  0xb9   : > { %p3183_p2 = pnand %p3181_p10, %p3442_p0  ;;  %p3190_p8 = por %p3189_p7, %p3188_p4 }
  0xbb   : > { %p3184_p3 = pneg %p3183_p2 }
  0xbd   : > { %p3191_p11 = pnand %p3190_p8, %p3184_p3 }
  0xbf   : > { %3194 = shalt.err (!%p3191_p11)
}
  0xc0   : > { %2908 = dma.hbm_to_vmem [thread:$0]  (!%p3426_p12), %s3863_s13, 256, %s484_s27, [#allocation12], %s3281_s15, %s3281_s15, %s3282_s20  }
  0xc1   : > { %p3897_p13 = scmp.ne.s32.totalorder %s3892_s30, 0 }
  0xc2   : > { %p3898_p1 = scmp.eq.s32.totalorder (!%p3897_p13), %s3390_s22, 0 }
  0xc3   : > { %520 = sbr.rel (%p3897_p13) target bundleno = 2673 (0xa71), region = 80 }
  0xca   : > { %3240 = dma.done.wait (%p3898_p1), [#allocation3], 64   ;;  %p3899_p0 = pmov %p3898_p1 }
  0xcc   : > { %3242 = vsyncadd (%p3899_p0), [#allocation3], 4294967232  ;;  %p3900_p6 = pmov %p3899_p0 }
  0xcd   : > { %p3901_p5 = pmov %p3899_p0 }
  0xce   : > { %3244 = dma.done.wait (%p3900_p6), [#allocation6], 80  }
  0xcf   : > { %3246 = vsyncadd (%p3901_p5), [#allocation6], 4294967216  ;;  %p3902_p9 = pmov %p3899_p0 }
  0xd0   : > { %p3903_p12 = pmov %p3899_p0 }
  0xd1   : > { %3248 = dma.done.wait (%p3902_p9), [#allocation9], 272  }
  0xd2   : > { %3250 = vsyncadd (%p3903_p12), [#allocation9], 4294967024  ;;  %p3904_p10 = pmov %p3899_p0 }
  0xd3   : > { %p3905_p2 = pmov %p3899_p0 }
  0xd4   : > { %3252 = dma.done.wait (%p3904_p10), [#allocation12], 272  }
  0xd5   : > { %3254 = vsyncadd (%p3905_p2), [#allocation12], 4294967024  ;;  %s2360_s2 = sshll.u32 %s3390_s22, 4  ;;  %v643_v16 = vld [vmem:[#allocation5] sm:$0xf]  ;;  %vm882_vm0 = vcmask 1043456  }
  0xd6   : > { %p598_p3 = scmp.lt.s32.totalorder %s2360_s2, 31  ;;  %2856 = vmatprep.subr.msk.bf16.mxu1 %vm882_vm0, %v643_v16  ;;  %v884_v17 = vsel %vm882_vm0, %v643_v16, 0  ;;  %v2989_v18 = vld [vmem:[%s3855_s5] sm:$0xff]   ;;  %vm857_vm1 = vcmask 64512   ;;  %v2990_v25 = vld [vmem:[%s3855_s5 + $0x8] sm:$0xff]   ;;  %vm1025_vm2 = vcmask 261120  }
  0xd7   : > { %2615 = vmatpush3.bf16.msra.mxu1 %v884_v17  ;;  %v2380_v44 = vld [vmem:[%s3854_s4] ss:$0 sm:$0xff]  ;;  %vm3285_vm3 = vmmov 0   ;;  %s3286_s20 = smov 32   ;;  %s3906_s25 = sld [smem:[#allocation21_spill]]  ;;  %vm2182_vm4 = vcmask 523264  }
  0xd8   : > { %s3919_s2 = smov (!%p598_p3, %s2360_s2), 31  ;;  %2632 = vmatprep.subr.bf16.mxu1 %v2989_v18  ;;  %s3287_s28 = smov 64   ;;  %vm2184_vm5 = vcmask 785408  }
  0xd9   : > { %s2361_s30 = sshll.u32 %s3919_s2, 2  ;;  %s3907_s3 = sld [smem:[#allocation26_spill]] }
  0xda   : > { %s601_s15 = scalar_lea.vmem %s3850_s0, %s2361_s30  ;;  %s3603_s27 = scalar_lea.vmem %s3851_s1, %s2361_s30 }
  0xdb   : > { %v2973_v0 = vld [vmem:[%s601_s15] sm:$0xff]   ;;  %v2974_v1 = vld [vmem:[%s601_s15 + $0x8] sm:$0xff]   ;;  %v2975_v2 = vld [vmem:[%s601_s15 + $0x10] sm:$0xff]   ;;  %s2445_s18 = sshll.u32 %s3390_s22, 7  ;;  %s3908_s23 = sld [smem:[#allocation30_spill]] }
  0xdc   : > { %2582 = vmatprep.subr.bf16.mxu0 %v2973_v0  ;;  %v2976_v3 = vld [vmem:[%s601_s15 + $0x18] sm:$0xff]   ;;  %v3606_v4 = vld [vmem:[%s3603_s27] sm:$0xff]   ;;  %v2978_v6 = vld [vmem:[%s601_s15 + $0x28] sm:$0xff]   ;;  %s3288_s29 = smov [#allocation14]  }
  0xdd   : > { %2583 = vmatpush3.bf16.msra.mxu0 %v2973_v0  ;;  %2598 = vmatprep.mubr.bf16.mxu0 %v3606_v4  ;;  %v2977_v5 = vld [vmem:[%s601_s15 + $0x20] sm:$0xff]   ;;  %v2979_v7 = vld [vmem:[%s601_s15 + $0x30] sm:$0xff]   ;;  %v2980_v8 = vld [vmem:[%s601_s15 + $0x38] sm:$0xff]   ;;  %s594_s19 = sand.u32 1, %s3906_s25  }
  0xde   : > { %2584 = vmatprep.subr.bf16.mxu0 %v2974_v1  ;;  %v3610_v9 = vld [vmem:[%s3603_s27 + $0x8] sm:$0xff]   ;;  %v3613_v10 = vld [vmem:[%s3603_s27 + $0x10] sm:$0xff]   ;;  %v3618_v11 = vld [vmem:[%s3603_s27 + $0x18] sm:$0xff]   ;;  %s2359_s16 = sshll.u32 %s594_s19, 3  ;;  %s2188_s22 = scalar_lea.sflag [#allocation4], %s594_s19 }
  0xdf   : > { %v3621_v12 = vld [vmem:[%s3603_s27 + $0x20] sm:$0xff]   ;;  %v3626_v13 = vld [vmem:[%s3603_s27 + $0x28] sm:$0xff]   ;;  %v3629_v14 = vld [vmem:[%s3603_s27 + $0x30] sm:$0xff]   ;;  %s596_s21 = scalar_lea.vmem [#allocation14], %s2359_s16  ;;  %p3909_p7 = scmp.ne.s32.totalorder %s3907_s3, 0 }
  0xe0   : > { %v3634_v15 = vld [vmem:[%s3603_s27 + $0x38] sm:$0xff]   ;;  %s2201_s2 = sshll.u32 %s596_s21, 4  ;;  %s3199_s27 = sshll.u32 %s3288_s29, 4  ;;  %s3810_s2 = int_to_ptr.vmem [resolvable:$true] %s2201_s2  ;;  %s3200_s27 = int_to_ptr.vmem [resolvable:$false] %s3199_s27 }
  0xe1   : > { %2585 = vmatpush3.bf16.msra.mxu0 %v2974_v1  ;;  %s3808_s15 = scalar_lea.hbm %s3908_s23, %s2445_s18  ;;  %s3201_s24 = scalar_lea.vmem %s3200_s27, 256 }
  0xe2   : > { %2586 = vmatprep.subr.bf16.mxu0 %v2975_v2  ;;  %p3202_p13 = scmp.lt.s32.totalorder %s3810_s2, %s3200_s27 }
  0xe5   : > { %2587 = vmatpush3.bf16.msra.mxu0 %v2975_v2 }
  0xe6   : > { %2588 = vmatprep.subr.bf16.mxu0 %v2976_v3 }
  0xe9   : > { %2589 = vmatpush3.bf16.msra.mxu0 %v2976_v3 }
  0xea   : > { %2590 = vmatprep.subr.bf16.mxu0 %v2977_v5 }
  0xed   : > { %2591 = vmatpush3.bf16.msra.mxu0 %v2977_v5 }
  0xee   : > { %2592 = vmatprep.subr.bf16.mxu0 %v2978_v6 }
  0xf1   : > { %2593 = vmatpush3.bf16.msra.mxu0 %v2978_v6 }
  0xf2   : > { %2594 = vmatprep.subr.bf16.mxu0 %v2979_v7 }
  0xf5   : > { %2595 = vmatpush3.bf16.msra.mxu0 %v2979_v7 }
  0xf6   : > { %2596 = vmatprep.subr.bf16.mxu0 %v2980_v8 }
  0xf9   : > { %2597 = vmatpush3.bf16.msra.mxu0 %v2980_v8 }
  0xfc   : > { %2599 = vmatmul.mubr.bf16.vlgmr.msra.gmra.mrb[0].mxu0 %v3610_v9 }
  0xfd   : > { %2602 = vmatprep.mubr.bf16.mxu0 %v3613_v10 }
 0x104   : > { %2603 = vmatmul.mubr.bf16.gmra.mrb[4].mxu0 %v3618_v11 }
 0x105   : > { %2606 = vmatprep.mubr.bf16.mxu0 %v3621_v12 }
 0x10c   : > { %2607 = vmatmul.mubr.bf16.gmra.mrb[8].mxu0 %v3626_v13 }
 0x10d   : > { %2610 = vmatprep.mubr.bf16.mxu0 %v3629_v14 }
 0x114   : > { %2611 = vmatmul.mubr.bf16.gmra.mrb[12].mxu0 %v3634_v15 }
 0x1cf   : > { %v2600_v19 = vpop.f32.mrb[0].mxu0 }
 0x1d0   : > { %v780_v20 = vpop.f32.mrb[1].mxu0 }
 0x1d1   : > { %v2601_v21 = vpop.f32.mrb[2].mxu0 }
 0x1d2   : > { %v844_v22 = vpack.c.bf16 %v2601_v21, %v2600_v19  ;;  %v783_v23 = vpop.f32.mrb[3].mxu0 }
 0x1d3   : > { %v843_v24 = vpack.c.bf16 %v783_v23, %v780_v20 }
 0x1d5   : > { %2616 = vmatprep.mubr.msk.bf16.mxu1 %vm857_vm1, %v843_v24 }
 0x1d6   : > { %2617 = vmatmul.mubr.msk.bf16.vlgmr.msra.gmra.mrb[0].mxu1 %vm857_vm1, %v844_v22 }
 0x1d7   : > { %v2604_v26 = vpop.f32.mrb[4].mxu0  ;;  %2633 = vmatpush3.bf16.msra.mxu1 %v2989_v18 }
 0x1d8   : > { %v796_v27 = vpop.f32.mrb[5].mxu0  ;;  %2634 = vmatprep.subr.bf16.mxu1 %v2990_v25 }
 0x1d9   : > { %v2605_v28 = vpop.f32.mrb[6].mxu0 }
 0x1da   : > { %v846_v29 = vpack.c.bf16 %v2605_v28, %v2604_v26  ;;  %v799_v30 = vpop.f32.mrb[7].mxu0 }
 0x1db   : > { %v845_v31 = vpack.c.bf16 %v799_v30, %v796_v27  ;;  %2635 = vmatpush3.bf16.msra.mxu1 %v2990_v25 }
 0x1dd   : > { %2620 = vmatprep.mubr.msk.bf16.mxu1 %vm857_vm1, %v845_v31 }
 0x1de   : > { %2621 = vmatmul.mubr.msk.bf16.gmra.mrb[4].mxu1 %vm857_vm1, %v846_v29 }
 0x1df   : > { %v2608_v32 = vpop.f32.mrb[8].mxu0 }
 0x1e0   : > { %v812_v33 = vpop.f32.mrb[9].mxu0 }
 0x1e1   : > { %v2609_v34 = vpop.f32.mrb[10].mxu0 }
 0x1e2   : > { %v848_v35 = vpack.c.bf16 %v2609_v34, %v2608_v32  ;;  %v815_v36 = vpop.f32.mrb[11].mxu0 }
 0x1e3   : > { %v847_v37 = vpack.c.bf16 %v815_v36, %v812_v33 }
 0x1e5   : > { %2624 = vmatprep.mubr.msk.bf16.mxu1 %vm857_vm1, %v847_v37 }
 0x1e6   : > { %2625 = vmatmul.mubr.msk.bf16.gmra.mrb[8].mxu1 %vm857_vm1, %v848_v35 }
 0x1e7   : > { %v2612_v38 = vpop.f32.mrb[12].mxu0 }
 0x1e8   : > { %v828_v39 = vpop.f32.mrb[13].mxu0 }
 0x1e9   : > { %v2613_v40 = vpop.f32.mrb[14].mxu0 }
 0x1ea   : > { %v850_v41 = vpack.c.bf16 %v2613_v40, %v2612_v38  ;;  %v831_v42 = vpop.f32.mrb[15].mxu0 }
 0x1eb   : > { %v849_v43 = vpack.c.bf16 %v831_v42, %v828_v39 }
 0x1ed   : > { %2628 = vmatprep.mubr.msk.bf16.mxu1 %vm857_vm1, %v849_v43 }
 0x1ee   : > { %2629 = vmatmul.mubr.msk.bf16.gmra.mrb[12].mxu1 %vm857_vm1, %v850_v41 }
 0x2a9   : > { %v2618_v45 = vpop.f32.mrb[0].mxu1 }
 0x2aa   : > { %v929_v46 = vadd.f32 %v2618_v45, %v2380_v44  ;;  %v920_v47 = vpop.f32.mrb[1].mxu1 }
 0x2ab   : > { %v921_v48 = vadd.f32 %v2380_v44, %v920_v47  ;;  %v2619_v49 = vpop.f32.mrb[2].mxu1 }
 0x2ac   : > { %v932_v50 = vadd.f32 %v2619_v49, %v2380_v44  ;;  %v923_v51 = vpop.f32.mrb[3].mxu1  ;;  %v985_v53 = vmax.f32 %v929_v46, 0.0  ;;  %v3284_v46 = vmov 0.0  }
 0x2ad   : > { %v924_v52 = vadd.f32 %v2380_v44, %v923_v51  ;;  %v983_v55 = vmax.f32 %v921_v48, 0.0  ;;  %2652 = vmatprep.subr.bf16.mxu0 %v3284_v46  ;;  %2668 = vmatprep.mubr.msk.bf16.mxu0 %vm3285_vm3, %v3284_v46 }
 0x2ae   : > { %v986_v54 = vmax.f32 %v932_v50, 0.0 }
 0x2af   : > { %v984_v56 = vmax.f32 %v924_v52, 0.0 }
 0x2b0   : > { %v1000_v57 = vpack.c.bf16 %v986_v54, %v985_v53 }
 0x2b1   : > { %v999_v58 = vpack.c.bf16 %v984_v56, %v983_v55  ;;  %v2622_v59 = vpop.f32.mrb[4].mxu1 }
 0x2b2   : > { %v945_v60 = vadd.f32 %v2622_v59, %v2380_v44  ;;  %v936_v61 = vpop.f32.mrb[5].mxu1 }
 0x2b3   : > { %v937_v62 = vadd.f32 %v2380_v44, %v936_v61  ;;  %v2623_v63 = vpop.f32.mrb[6].mxu1  ;;  %2636 = vmatprep.mubr.msk.bf16.mxu1 %vm1025_vm2, %v999_v58 }
 0x2b4   : > { %v948_v0 = vadd.f32 %v2623_v63, %v2380_v44  ;;  %v939_v1 = vpop.f32.mrb[7].mxu1  ;;  %2637 = vmatmul.mubr.msk.bf16.vlgmr.msra.gmra.mrb[16].mxu1 %vm1025_vm2, %v1000_v57  ;;  %v989_v3 = vmax.f32 %v945_v60, 0.0 }
 0x2b5   : > { %v940_v2 = vadd.f32 %v2380_v44, %v939_v1  ;;  %v987_v6 = vmax.f32 %v937_v62, 0.0 }
 0x2b6   : > { %v990_v5 = vmax.f32 %v948_v0, 0.0 }
 0x2b7   : > { %v988_v7 = vmax.f32 %v940_v2, 0.0 }
 0x2b8   : > { %v1002_v8 = vpack.c.bf16 %v990_v5, %v989_v3 }
 0x2b9   : > { %v1001_v16 = vpack.c.bf16 %v988_v7, %v987_v6  ;;  %v2626_v17 = vpop.f32.mrb[8].mxu1 }
 0x2ba   : > { %v961_v18 = vadd.f32 %v2626_v17, %v2380_v44  ;;  %v952_v19 = vpop.f32.mrb[9].mxu1 }
 0x2bb   : > { %v953_v20 = vadd.f32 %v2380_v44, %v952_v19  ;;  %v2627_v21 = vpop.f32.mrb[10].mxu1  ;;  %2640 = vmatprep.mubr.msk.bf16.mxu1 %vm1025_vm2, %v1001_v16 }
 0x2bc   : > { %v964_v22 = vadd.f32 %v2627_v21, %v2380_v44  ;;  %v955_v23 = vpop.f32.mrb[11].mxu1  ;;  %2641 = vmatmul.mubr.msk.bf16.gmra.mrb[20].mxu1 %vm1025_vm2, %v1002_v8  ;;  %v993_v25 = vmax.f32 %v961_v18, 0.0 }
 0x2bd   : > { %v956_v24 = vadd.f32 %v2380_v44, %v955_v23  ;;  %v991_v27 = vmax.f32 %v953_v20, 0.0 }
 0x2be   : > { %v994_v26 = vmax.f32 %v964_v22, 0.0 }
 0x2bf   : > { %v992_v28 = vmax.f32 %v956_v24, 0.0 }
 0x2c0   : > { %v1004_v29 = vpack.c.bf16 %v994_v26, %v993_v25 }
 0x2c1   : > { %v1003_v30 = vpack.c.bf16 %v992_v28, %v991_v27  ;;  %v2630_v31 = vpop.f32.mrb[12].mxu1 }
 0x2c2   : > { %v977_v32 = vadd.f32 %v2630_v31, %v2380_v44  ;;  %v968_v33 = vpop.f32.mrb[13].mxu1 }
 0x2c3   : > { %v969_v34 = vadd.f32 %v2380_v44, %v968_v33  ;;  %v2631_v35 = vpop.f32.mrb[14].mxu1  ;;  %2644 = vmatprep.mubr.msk.bf16.mxu1 %vm1025_vm2, %v1003_v30 }
 0x2c4   : > { %v980_v36 = vadd.f32 %v2631_v35, %v2380_v44  ;;  %v971_v37 = vpop.f32.mrb[15].mxu1  ;;  %2645 = vmatmul.mubr.msk.bf16.gmra.mrb[24].mxu1 %vm1025_vm2, %v1004_v29  ;;  %v997_v39 = vmax.f32 %v977_v32, 0.0 }
 0x2c5   : > { %v972_v38 = vadd.f32 %v2380_v44, %v971_v37  ;;  %v995_v41 = vmax.f32 %v969_v34, 0.0  ;;  %v3666_v44 = vld [vmem:[#allocation7] ss:$0 sm:$0xff] }
 0x2c6   : > { %v998_v40 = vmax.f32 %v980_v36, 0.0 }
 0x2c7   : > { %v996_v42 = vmax.f32 %v972_v38, 0.0 }
 0x2c8   : > { %v1006_v43 = vpack.c.bf16 %v998_v40, %v997_v39 }
 0x2c9   : > { %v1005_v45 = vpack.c.bf16 %v996_v42, %v995_v41 }
 0x2cb   : > { %2648 = vmatprep.mubr.msk.bf16.mxu1 %vm1025_vm2, %v1005_v45 }
 0x2cc   : > { %2649 = vmatmul.mubr.msk.bf16.gmra.mrb[28].mxu1 %vm1025_vm2, %v1006_v43 }
 0x2cd   : > { %2688 = vmatprep.mubr.bf16.mxu1 %v3606_v4 }
 0x387   : > { %v2638_v47 = vpop.f32.mrb[16].mxu1 }
 0x388   : > { %v1093_v48 = vadd.f32 %v2638_v47, %v3666_v44  ;;  %v1084_v49 = vpop.f32.mrb[17].mxu1 }
 0x389   : > { %v1085_v50 = vadd.f32 %v3666_v44, %v1084_v49  ;;  %v2639_v51 = vpop.f32.mrb[18].mxu1  ;;  %v3694_v49 = vld [vmem:[#allocation2] sm:$0xf] }
 0x38a   : > { %v1096_v52 = vadd.f32 %v2639_v51, %v3666_v44  ;;  %v1087_v53 = vpop.f32.mrb[19].mxu1  ;;  %v1149_v55 = vmax.f32 %v1093_v48, 0.0  ;;  %v2993_v51 = vld [vmem:[#allocation10] sm:$0xff]  }
 0x38b   : > { %v1088_v54 = vadd.f32 %v3666_v44, %v1087_v53  ;;  %v1147_v57 = vmax.f32 %v1085_v50, 0.0  ;;  %v2992_v50 = vld [vmem:[%s3857_s7 + $0x8] sm:$0xff]  }
 0x38c   : > { %v1150_v56 = vmax.f32 %v1096_v52, 0.0  ;;  %v2994_v52 = vld [vmem:[#allocation10 + $0x8] sm:$0xff]  }
 0x38d   : > { %v1148_v58 = vmax.f32 %v1088_v54, 0.0 }
 0x38e   : > { %v1164_v59 = vpack.c.bf16 %v1150_v56, %v1149_v55 }
 0x38f   : > { %v1163_v60 = vpack.c.bf16 %v1148_v58, %v1147_v57  ;;  %v2642_v61 = vpop.f32.mrb[20].mxu1 }
 0x390   : > { %v1109_v62 = vadd.f32 %v2642_v61, %v3666_v44  ;;  %v1100_v63 = vpop.f32.mrb[21].mxu1 }
 0x391   : > { %v1101_v0 = vadd.f32 %v3666_v44, %v1100_v63  ;;  %v2643_v1 = vpop.f32.mrb[22].mxu1  ;;  %2653 = vmatpush3.bf16.msra.mxu0 %v1163_v60  ;;  %2672 = vmatprep.subr.bf16.mxu1 %v1163_v60 }
 0x392   : > { %v1112_v2 = vadd.f32 %v2643_v1, %v3666_v44  ;;  %v1103_v3 = vpop.f32.mrb[23].mxu1  ;;  %2673 = vmatpush3.bf16.msra.mxu1 %v1163_v60  ;;  %2654 = vmatprep.subr.bf16.mxu0 %v3284_v46  ;;  %v1153_v6 = vmax.f32 %v1109_v62, 0.0 }
 0x393   : > { %v1104_v5 = vadd.f32 %v3666_v44, %v1103_v3  ;;  %2674 = vmatprep.subr.bf16.mxu1 %v1164_v59  ;;  %v1151_v8 = vmax.f32 %v1101_v0, 0.0 }
 0x394   : > { %v1154_v7 = vmax.f32 %v1112_v2, 0.0 }
 0x395   : > { %v1152_v16 = vmax.f32 %v1104_v5, 0.0  ;;  %2655 = vmatpush3.bf16.msra.mxu0 %v1164_v59 }
 0x396   : > { %v1166_v17 = vpack.c.bf16 %v1154_v7, %v1153_v6  ;;  %2675 = vmatpush3.bf16.msra.mxu1 %v1164_v59  ;;  %2656 = vmatprep.subr.bf16.mxu0 %v3284_v46 }
 0x397   : > { %v1165_v18 = vpack.c.bf16 %v1152_v16, %v1151_v8  ;;  %v2646_v19 = vpop.f32.mrb[24].mxu1 }
 0x398   : > { %v1125_v20 = vadd.f32 %v2646_v19, %v3666_v44  ;;  %v1116_v21 = vpop.f32.mrb[25].mxu1 }
 0x399   : > { %v1117_v22 = vadd.f32 %v3666_v44, %v1116_v21  ;;  %v2647_v23 = vpop.f32.mrb[26].mxu1  ;;  %2657 = vmatpush3.bf16.msra.mxu0 %v1165_v18  ;;  %2676 = vmatprep.subr.bf16.mxu1 %v1165_v18 }
 0x39a   : > { %v1128_v24 = vadd.f32 %v2647_v23, %v3666_v44  ;;  %v1119_v25 = vpop.f32.mrb[27].mxu1  ;;  %2677 = vmatpush3.bf16.msra.mxu1 %v1165_v18  ;;  %2658 = vmatprep.subr.bf16.mxu0 %v3284_v46  ;;  %v1157_v27 = vmax.f32 %v1125_v20, 0.0 }
 0x39b   : > { %v1120_v26 = vadd.f32 %v3666_v44, %v1119_v25  ;;  %2678 = vmatprep.subr.bf16.mxu1 %v1166_v17  ;;  %v1155_v29 = vmax.f32 %v1117_v22, 0.0  ;;  %v2400_v25 = vld [vmem:[#allocation8] ss:$0 sm:$0xff] }
 0x39c   : > { %v1158_v28 = vmax.f32 %v1128_v24, 0.0 }
 0x39d   : > { %v1156_v30 = vmax.f32 %v1120_v26, 0.0  ;;  %2659 = vmatpush3.bf16.msra.mxu0 %v1166_v17 }
 0x39e   : > { %v1168_v31 = vpack.c.bf16 %v1158_v28, %v1157_v27  ;;  %2679 = vmatpush3.bf16.msra.mxu1 %v1166_v17  ;;  %2660 = vmatprep.subr.bf16.mxu0 %v3284_v46 }
 0x39f   : > { %v1167_v32 = vpack.c.bf16 %v1156_v30, %v1155_v29  ;;  %v2650_v33 = vpop.f32.mrb[28].mxu1 }
 0x3a0   : > { %v1141_v34 = vadd.f32 %v2650_v33, %v3666_v44  ;;  %v1132_v35 = vpop.f32.mrb[29].mxu1 }
 0x3a1   : > { %v1133_v36 = vadd.f32 %v3666_v44, %v1132_v35  ;;  %v2651_v37 = vpop.f32.mrb[30].mxu1  ;;  %2661 = vmatpush3.bf16.msra.mxu0 %v1167_v32  ;;  %2680 = vmatprep.subr.bf16.mxu1 %v1167_v32 }
 0x3a2   : > { %v1144_v38 = vadd.f32 %v2651_v37, %v3666_v44  ;;  %v1135_v39 = vpop.f32.mrb[31].mxu1  ;;  %2681 = vmatpush3.bf16.msra.mxu1 %v1167_v32  ;;  %2662 = vmatprep.subr.bf16.mxu0 %v3284_v46  ;;  %v1161_v41 = vmax.f32 %v1141_v34, 0.0 }
 0x3a3   : > { %v1136_v40 = vadd.f32 %v3666_v44, %v1135_v39  ;;  %2682 = vmatprep.subr.bf16.mxu1 %v1168_v31  ;;  %v1159_v43 = vmax.f32 %v1133_v36, 0.0  ;;  %v2991_v44 = vld [vmem:[%s3857_s7] sm:$0xff]  }
 0x3a4   : > { %v1162_v42 = vmax.f32 %v1144_v38, 0.0 }
 0x3a5   : > { %v1160_v45 = vmax.f32 %v1136_v40, 0.0  ;;  %2663 = vmatpush3.bf16.msra.mxu0 %v1168_v31 }
 0x3a6   : > { %v1170_v47 = vpack.c.bf16 %v1162_v42, %v1161_v41  ;;  %2683 = vmatpush3.bf16.msra.mxu1 %v1168_v31  ;;  %2664 = vmatprep.subr.bf16.mxu0 %v3284_v46 }
 0x3a7   : > { %v1169_v48 = vpack.c.bf16 %v1160_v45, %v1159_v43 }
 0x3a9   : > { %2665 = vmatpush3.bf16.msra.mxu0 %v1169_v48  ;;  %2684 = vmatprep.subr.bf16.mxu1 %v1169_v48 }
 0x3aa   : > { %2685 = vmatpush3.bf16.msra.mxu1 %v1169_v48  ;;  %2666 = vmatprep.subr.bf16.mxu0 %v3284_v46 }
 0x3ab   : > { %2686 = vmatprep.subr.bf16.mxu1 %v1170_v47 }
 0x3ad   : > { %2667 = vmatpush3.bf16.msra.mxu0 %v1170_v47 }
 0x3ae   : > { %2687 = vmatpush3.bf16.msra.mxu1 %v1170_v47  ;;  %2704 = vmatprep.subr.bf16.mxu0 %v2991_v44 }
 0x3af   : > { %2724 = vmatprep.subr.bf16.mxu1 %v2993_v51 }
 0x3b0   : > { %2669 = vmatmul.mubr.bf16.vlgmr.msra.gmra.mrb[16].mxu0 %v3694_v49 }
 0x3b1   : > { %2689 = vmatmul.mubr.bf16.vlgmr.msra.gmra.mrb[32].mxu1 %v3610_v9  ;;  %2705 = vmatpush3.bf16.msra.mxu0 %v2991_v44 }
 0x3b2   : > { %2692 = vmatprep.mubr.bf16.mxu1 %v3613_v10  ;;  %2706 = vmatprep.subr.bf16.mxu0 %v2992_v50 }
 0x3b3   : > { %2725 = vmatpush3.bf16.msra.mxu1 %v2993_v51 }
 0x3b4   : > { %2726 = vmatprep.subr.bf16.mxu1 %v2994_v52 }
 0x3b5   : > { %2707 = vmatpush3.bf16.msra.mxu0 %v2992_v50 }
 0x3b6   : > { %2744 = vmatprep.subr.bf16.mxu0 %v3284_v46 }
 0x3b7   : > { %2727 = vmatpush3.bf16.msra.mxu1 %v2994_v52 }
 0x3b9   : > { %2693 = vmatmul.mubr.bf16.gmra.mrb[36].mxu1 %v3618_v11 }
 0x3ba   : > { %2696 = vmatprep.mubr.bf16.mxu1 %v3621_v12 }
 0x3c1   : > { %2697 = vmatmul.mubr.bf16.gmra.mrb[40].mxu1 %v3626_v13 }
 0x3c2   : > { %2700 = vmatprep.mubr.bf16.mxu1 %v3629_v14 }
 0x3c9   : > { %2701 = vmatmul.mubr.bf16.gmra.mrb[44].mxu1 %v3634_v15 }
 0x483   : > { %v3708_v53 = vpop.f32.mrb[16].mxu0 }
 0x484   : > { %v2690_v54 = vpop.f32.mrb[32].mxu1  ;;  %v2670_v55 = vpop.f32.mrb[17].mxu0 }
 0x485   : > { %v1255_v56 = vpop.f32.mrb[33].mxu1  ;;  %v1208_v57 = vpop.f32.mrb[18].mxu0 }
 0x486   : > { %v2691_v58 = vpop.f32.mrb[34].mxu1  ;;  %v2671_v59 = vpop.f32.mrb[19].mxu0 }
 0x487   : > { %v1319_v60 = vpack.c.bf16 %v2691_v58, %v2690_v54  ;;  %v1258_v61 = vpop.f32.mrb[35].mxu1 }
 0x488   : > { %v1318_v62 = vpack.c.bf16 %v1258_v61, %v1255_v56 }
 0x48a   : > { %2708 = vmatprep.mubr.msk.bf16.mxu0 %vm1025_vm2, %v1318_v62 }
 0x48b   : > { %2709 = vmatmul.mubr.msk.bf16.vlgmr.msra.gmra.mrb[20].mxu0 %vm1025_vm2, %v1319_v60 }
 0x48c   : > { %v2694_v63 = vpop.f32.mrb[36].mxu1 }
 0x48d   : > { %v1271_v0 = vpop.f32.mrb[37].mxu1 }
 0x48e   : > { %v2695_v1 = vpop.f32.mrb[38].mxu1 }
 0x48f   : > { %v1321_v2 = vpack.c.bf16 %v2695_v1, %v2694_v63  ;;  %v1274_v3 = vpop.f32.mrb[39].mxu1 }
 0x490   : > { %v1320_v5 = vpack.c.bf16 %v1274_v3, %v1271_v0 }
 0x492   : > { %2712 = vmatprep.mubr.msk.bf16.mxu0 %vm1025_vm2, %v1320_v5 }
 0x493   : > { %2713 = vmatmul.mubr.msk.bf16.gmra.mrb[24].mxu0 %vm1025_vm2, %v1321_v2 }
 0x494   : > { %v2698_v6 = vpop.f32.mrb[40].mxu1 }
 0x495   : > { %v1287_v7 = vpop.f32.mrb[41].mxu1 }
 0x496   : > { %v2699_v8 = vpop.f32.mrb[42].mxu1 }
 0x497   : > { %v1323_v16 = vpack.c.bf16 %v2699_v8, %v2698_v6  ;;  %v1290_v17 = vpop.f32.mrb[43].mxu1 }
 0x498   : > { %v1322_v18 = vpack.c.bf16 %v1290_v17, %v1287_v7 }
 0x49a   : > { %2716 = vmatprep.mubr.msk.bf16.mxu0 %vm1025_vm2, %v1322_v18 }
 0x49b   : > { %2717 = vmatmul.mubr.msk.bf16.gmra.mrb[28].mxu0 %vm1025_vm2, %v1323_v16 }
 0x49c   : > { %v2702_v19 = vpop.f32.mrb[44].mxu1 }
 0x49d   : > { %v1303_v20 = vpop.f32.mrb[45].mxu1 }
 0x49e   : > { %v2703_v21 = vpop.f32.mrb[46].mxu1 }
 0x49f   : > { %v1325_v22 = vpack.c.bf16 %v2703_v21, %v2702_v19  ;;  %v1306_v23 = vpop.f32.mrb[47].mxu1 }
 0x4a0   : > { %v1324_v24 = vpack.c.bf16 %v1306_v23, %v1303_v20 }
 0x4a2   : > { %2720 = vmatprep.mubr.msk.bf16.mxu0 %vm1025_vm2, %v1324_v24 }
 0x4a3   : > { %2721 = vmatmul.mubr.msk.bf16.gmra.mrb[32].mxu0 %vm1025_vm2, %v1325_v22 }
 0x4a4   : > { %2760 = vmatprep.mubr.msk.bf16.mxu0 %vm3285_vm3, %v3284_v46 }
 0x55e   : > { %v2710_v26 = vpop.f32.mrb[20].mxu0 }
 0x55f   : > { %v1411_v27 = vadd.f32 %v2710_v26, %v2400_v25  ;;  %v1402_v28 = vpop.f32.mrb[21].mxu0 }
 0x560   : > { %v1403_v29 = vadd.f32 %v2400_v25, %v1402_v28  ;;  %v2711_v30 = vpop.f32.mrb[22].mxu0 }
 0x561   : > { %v1414_v31 = vadd.f32 %v2711_v30, %v2400_v25  ;;  %v1405_v32 = vpop.f32.mrb[23].mxu0  ;;  %v1467_v34 = vmax.f32 %v1411_v27, 0.0  ;;  %v3729_v30 = vld [vmem:[#allocation11] ss:$0 sm:$0xff] }
 0x562   : > { %v1406_v33 = vadd.f32 %v2400_v25, %v1405_v32  ;;  %v1465_v36 = vmax.f32 %v1403_v29, 0.0 }
 0x563   : > { %v1468_v35 = vmax.f32 %v1414_v31, 0.0 }
 0x564   : > { %v1466_v37 = vmax.f32 %v1406_v33, 0.0 }
 0x565   : > { %v1482_v38 = vpack.c.bf16 %v1468_v35, %v1467_v34 }
 0x566   : > { %v1481_v39 = vpack.c.bf16 %v1466_v37, %v1465_v36  ;;  %v2714_v40 = vpop.f32.mrb[24].mxu0 }
 0x567   : > { %v1427_v41 = vadd.f32 %v2714_v40, %v2400_v25  ;;  %v1418_v42 = vpop.f32.mrb[25].mxu0 }
 0x568   : > { %v1419_v43 = vadd.f32 %v2400_v25, %v1418_v42  ;;  %v2715_v45 = vpop.f32.mrb[26].mxu0  ;;  %2728 = vmatprep.mubr.msk.bf16.mxu1 %vm1025_vm2, %v1481_v39 }
 0x569   : > { %v1430_v47 = vadd.f32 %v2715_v45, %v2400_v25  ;;  %v1421_v48 = vpop.f32.mrb[27].mxu0  ;;  %2729 = vmatmul.mubr.msk.bf16.vlgmr.msra.gmra.mrb[48].mxu1 %vm1025_vm2, %v1482_v38  ;;  %v1471_v50 = vmax.f32 %v1427_v41, 0.0 }
 0x56a   : > { %v1422_v44 = vadd.f32 %v2400_v25, %v1421_v48  ;;  %v1469_v52 = vmax.f32 %v1419_v43, 0.0 }
 0x56b   : > { %v1472_v51 = vmax.f32 %v1430_v47, 0.0 }
 0x56c   : > { %v1470_v54 = vmax.f32 %v1422_v44, 0.0 }
 0x56d   : > { %v1484_v55 = vpack.c.bf16 %v1472_v51, %v1471_v50 }
 0x56e   : > { %v1483_v56 = vpack.c.bf16 %v1470_v54, %v1469_v52  ;;  %v2718_v57 = vpop.f32.mrb[28].mxu0 }
 0x56f   : > { %v1443_v58 = vadd.f32 %v2718_v57, %v2400_v25  ;;  %v1434_v59 = vpop.f32.mrb[29].mxu0 }
 0x570   : > { %v1435_v60 = vadd.f32 %v2400_v25, %v1434_v59  ;;  %v2719_v61 = vpop.f32.mrb[30].mxu0  ;;  %2732 = vmatprep.mubr.msk.bf16.mxu1 %vm1025_vm2, %v1483_v56 }
 0x571   : > { %v1446_v62 = vadd.f32 %v2719_v61, %v2400_v25  ;;  %v1437_v63 = vpop.f32.mrb[31].mxu0  ;;  %2733 = vmatmul.mubr.msk.bf16.gmra.mrb[52].mxu1 %vm1025_vm2, %v1484_v55  ;;  %v1475_v1 = vmax.f32 %v1443_v58, 0.0 }
 0x572   : > { %v1438_v0 = vadd.f32 %v2400_v25, %v1437_v63  ;;  %v1473_v3 = vmax.f32 %v1435_v60, 0.0 }
 0x573   : > { %v1476_v2 = vmax.f32 %v1446_v62, 0.0 }
 0x574   : > { %v1474_v5 = vmax.f32 %v1438_v0, 0.0 }
 0x575   : > { %v1486_v6 = vpack.c.bf16 %v1476_v2, %v1475_v1 }
 0x576   : > { %v1485_v7 = vpack.c.bf16 %v1474_v5, %v1473_v3  ;;  %v2722_v8 = vpop.f32.mrb[32].mxu0 }
 0x577   : > { %v1459_v16 = vadd.f32 %v2722_v8, %v2400_v25  ;;  %v1450_v17 = vpop.f32.mrb[33].mxu0 }
 0x578   : > { %v1451_v18 = vadd.f32 %v2400_v25, %v1450_v17  ;;  %v2723_v19 = vpop.f32.mrb[34].mxu0  ;;  %2736 = vmatprep.mubr.msk.bf16.mxu1 %vm1025_vm2, %v1485_v7 }
 0x579   : > { %v1462_v20 = vadd.f32 %v2723_v19, %v2400_v25  ;;  %v1453_v21 = vpop.f32.mrb[35].mxu0  ;;  %2737 = vmatmul.mubr.msk.bf16.gmra.mrb[56].mxu1 %vm1025_vm2, %v1486_v6  ;;  %v1479_v23 = vmax.f32 %v1459_v16, 0.0 }
 0x57a   : > { %v1454_v22 = vadd.f32 %v2400_v25, %v1453_v21  ;;  %v1477_v26 = vmax.f32 %v1451_v18, 0.0 }
 0x57b   : > { %v1480_v24 = vmax.f32 %v1462_v20, 0.0 }
 0x57c   : > { %v1478_v27 = vmax.f32 %v1454_v22, 0.0 }
 0x57d   : > { %v1488_v28 = vpack.c.bf16 %v1480_v24, %v1479_v23 }
 0x57e   : > { %v1487_v29 = vpack.c.bf16 %v1478_v27, %v1477_v26 }
 0x580   : > { %2740 = vmatprep.mubr.msk.bf16.mxu1 %vm1025_vm2, %v1487_v29 }
 0x581   : > { %2741 = vmatmul.mubr.msk.bf16.gmra.mrb[60].mxu1 %vm1025_vm2, %v1488_v28 }
 0x582   : > { %2780 = vmatprep.mubr.bf16.mxu1 %v3606_v4 }
 0x63c   : > { %v2730_v31 = vpop.f32.mrb[48].mxu1 }
 0x63d   : > { %v1574_v32 = vadd.f32 %v2730_v31, %v3729_v30  ;;  %v1565_v33 = vpop.f32.mrb[49].mxu1 }
 0x63e   : > { %v1566_v25 = vadd.f32 %v3729_v30, %v1565_v33  ;;  %v2731_v34 = vpop.f32.mrb[50].mxu1 }
 0x63f   : > { %v1577_v35 = vadd.f32 %v2731_v34, %v3729_v30  ;;  %v1568_v36 = vpop.f32.mrb[51].mxu1  ;;  %v1630_v38 = vmax.f32 %v1574_v32, 0.0 }
 0x640   : > { %v1569_v37 = vadd.f32 %v3729_v30, %v1568_v36  ;;  %v1628_v40 = vmax.f32 %v1566_v25, 0.0 }
 0x641   : > { %v1631_v39 = vmax.f32 %v1577_v35, 0.0 }
 0x642   : > { %v1629_v41 = vmax.f32 %v1569_v37, 0.0 }
 0x643   : > { %v1645_v42 = vpack.c.bf16 %v1631_v39, %v1630_v38  ;;  %v2998_v38 = vld [vmem:[#allocation13 + $0x8] sm:$0xff]  }
 0x644   : > { %v1644_v4 = vpack.c.bf16 %v1629_v41, %v1628_v40  ;;  %v2734_v43 = vpop.f32.mrb[52].mxu1 }
 0x645   : > { %v1590_v45 = vadd.f32 %v2734_v43, %v3729_v30  ;;  %v1581_v47 = vpop.f32.mrb[53].mxu1 }
 0x646   : > { %v1582_v48 = vadd.f32 %v3729_v30, %v1581_v47  ;;  %v2735_v44 = vpop.f32.mrb[54].mxu1  ;;  %2745 = vmatpush3.bf16.msra.mxu0 %v1644_v4  ;;  %2764 = vmatprep.subr.bf16.mxu1 %v1644_v4 }
 0x647   : > { %v1593_v50 = vadd.f32 %v2735_v44, %v3729_v30  ;;  %v1584_v51 = vpop.f32.mrb[55].mxu1  ;;  %2765 = vmatpush3.bf16.msra.mxu1 %v1644_v4  ;;  %2746 = vmatprep.subr.bf16.mxu0 %v3284_v46  ;;  %v1634_v54 = vmax.f32 %v1590_v45, 0.0 }
 0x648   : > { %v1585_v52 = vadd.f32 %v3729_v30, %v1584_v51  ;;  %2766 = vmatprep.subr.bf16.mxu1 %v1645_v42  ;;  %v1632_v56 = vmax.f32 %v1582_v48, 0.0 }
 0x649   : > { %v1635_v55 = vmax.f32 %v1593_v50, 0.0 }
 0x64a   : > { %v1633_v57 = vmax.f32 %v1585_v52, 0.0  ;;  %2747 = vmatpush3.bf16.msra.mxu0 %v1645_v42 }
 0x64b   : > { %v1647_v58 = vpack.c.bf16 %v1635_v55, %v1634_v54  ;;  %2767 = vmatpush3.bf16.msra.mxu1 %v1645_v42  ;;  %2748 = vmatprep.subr.bf16.mxu0 %v3284_v46 }
 0x64c   : > { %v1646_v59 = vpack.c.bf16 %v1633_v57, %v1632_v56  ;;  %v2738_v60 = vpop.f32.mrb[56].mxu1 }
 0x64d   : > { %v1606_v61 = vadd.f32 %v2738_v60, %v3729_v30  ;;  %v1597_v62 = vpop.f32.mrb[57].mxu1 }
 0x64e   : > { %v1598_v63 = vadd.f32 %v3729_v30, %v1597_v62  ;;  %v2739_v0 = vpop.f32.mrb[58].mxu1  ;;  %2749 = vmatpush3.bf16.msra.mxu0 %v1646_v59  ;;  %2768 = vmatprep.subr.bf16.mxu1 %v1646_v59 }
 0x64f   : > { %v1609_v1 = vadd.f32 %v2739_v0, %v3729_v30  ;;  %v1600_v2 = vpop.f32.mrb[59].mxu1  ;;  %2769 = vmatpush3.bf16.msra.mxu1 %v1646_v59  ;;  %2750 = vmatprep.subr.bf16.mxu0 %v3284_v46  ;;  %v1638_v5 = vmax.f32 %v1606_v61, 0.0  ;;  %v2422_v59 = vld [vmem:[%s3862_s12] ss:$0 sm:$0xff] }
 0x650   : > { %v1601_v3 = vadd.f32 %v3729_v30, %v1600_v2  ;;  %2770 = vmatprep.subr.bf16.mxu1 %v1647_v58  ;;  %v1636_v7 = vmax.f32 %v1598_v63, 0.0 }
 0x651   : > { %v1639_v6 = vmax.f32 %v1609_v1, 0.0 }
 0x652   : > { %v1637_v8 = vmax.f32 %v1601_v3, 0.0  ;;  %2751 = vmatpush3.bf16.msra.mxu0 %v1647_v58 }
 0x653   : > { %v1649_v16 = vpack.c.bf16 %v1639_v6, %v1638_v5  ;;  %2771 = vmatpush3.bf16.msra.mxu1 %v1647_v58  ;;  %2752 = vmatprep.subr.bf16.mxu0 %v3284_v46 }
 0x654   : > { %v1648_v17 = vpack.c.bf16 %v1637_v8, %v1636_v7  ;;  %v2742_v18 = vpop.f32.mrb[60].mxu1 }
 0x655   : > { %v1622_v19 = vadd.f32 %v2742_v18, %v3729_v30  ;;  %v1613_v20 = vpop.f32.mrb[61].mxu1 }
 0x656   : > { %v1614_v21 = vadd.f32 %v3729_v30, %v1613_v20  ;;  %v2743_v22 = vpop.f32.mrb[62].mxu1  ;;  %2753 = vmatpush3.bf16.msra.mxu0 %v1648_v17  ;;  %2772 = vmatprep.subr.bf16.mxu1 %v1648_v17 }
 0x657   : > { %v1625_v23 = vadd.f32 %v2743_v22, %v3729_v30  ;;  %v1616_v24 = vpop.f32.mrb[63].mxu1  ;;  %2773 = vmatpush3.bf16.msra.mxu1 %v1648_v17  ;;  %2754 = vmatprep.subr.bf16.mxu0 %v3284_v46  ;;  %v1642_v27 = vmax.f32 %v1622_v19, 0.0 }
 0x658   : > { %v1617_v26 = vadd.f32 %v3729_v30, %v1616_v24  ;;  %2774 = vmatprep.subr.bf16.mxu1 %v1649_v16  ;;  %v1640_v29 = vmax.f32 %v1614_v21, 0.0  ;;  %v2995_v30 = vld [vmem:[%s3861_s11] sm:$0xff]  }
 0x659   : > { %v1643_v28 = vmax.f32 %v1625_v23, 0.0 }
 0x65a   : > { %v1641_v31 = vmax.f32 %v1617_v26, 0.0  ;;  %2755 = vmatpush3.bf16.msra.mxu0 %v1649_v16 }
 0x65b   : > { %v1651_v32 = vpack.c.bf16 %v1643_v28, %v1642_v27  ;;  %2775 = vmatpush3.bf16.msra.mxu1 %v1649_v16  ;;  %2756 = vmatprep.subr.bf16.mxu0 %v3284_v46 }
 0x65c   : > { %v1650_v33 = vpack.c.bf16 %v1641_v31, %v1640_v29 }
 0x65e   : > { %2757 = vmatpush3.bf16.msra.mxu0 %v1650_v33  ;;  %2776 = vmatprep.subr.bf16.mxu1 %v1650_v33 }
 0x65f   : > { %2777 = vmatpush3.bf16.msra.mxu1 %v1650_v33  ;;  %2758 = vmatprep.subr.bf16.mxu0 %v3284_v46 }
 0x660   : > { %2778 = vmatprep.subr.bf16.mxu1 %v1651_v32 }
 0x662   : > { %2759 = vmatpush3.bf16.msra.mxu0 %v1651_v32 }
 0x663   : > { %2779 = vmatpush3.bf16.msra.mxu1 %v1651_v32  ;;  %2796 = vmatprep.subr.bf16.mxu0 %v2995_v30 }
 0x664   : > { %2836 = vmatprep.subr.bf16.mxu1 %v3284_v46 }
 0x665   : > { %2761 = vmatmul.mubr.bf16.vlgmr.msra.gmra.mrb[36].mxu0 %v3694_v49 }
 0x666   : > { %2781 = vmatmul.mubr.bf16.vlgmr.msra.gmra.mrb[64].mxu1 %v3610_v9  ;;  %2797 = vmatpush3.bf16.msra.mxu0 %v2995_v30  ;;  %v2996_v9 = vld [vmem:[%s3861_s11 + $0x8] sm:$0xff]  }
 0x667   : > { %2784 = vmatprep.mubr.bf16.mxu1 %v3613_v10  ;;  %2798 = vmatprep.subr.bf16.mxu0 %v2996_v9  ;;  %v2997_v10 = vld [vmem:[#allocation13] sm:$0xff]  }
 0x66a   : > { %2799 = vmatpush3.bf16.msra.mxu0 %v2996_v9 }
 0x66b   : > { %2816 = vmatprep.subr.bf16.mxu0 %v2997_v10 }
 0x66e   : > { %2785 = vmatmul.mubr.bf16.gmra.mrb[68].mxu1 %v3618_v11 }
 0x66f   : > { %2788 = vmatprep.mubr.bf16.mxu1 %v3621_v12 }
 0x676   : > { %2789 = vmatmul.mubr.bf16.gmra.mrb[72].mxu1 %v3626_v13 }
 0x677   : > { %2792 = vmatprep.mubr.bf16.mxu1 %v3629_v14 }
 0x67e   : > { %2793 = vmatmul.mubr.bf16.gmra.mrb[76].mxu1 %v3634_v15 }
 0x67f   : > { %2852 = vmatprep.mubr.msk.bf16.mxu1 %vm3285_vm3, %v3284_v46 }
 0x738   : > { %v1686_v11 = vpop.f32.mrb[36].mxu0 }
 0x739   : > { %v2782_v12 = vpop.f32.mrb[64].mxu1  ;;  %2174 = vrot.lane.b32.xlu0 %v1686_v11, %s3286_s20  ;;  %v2762_v13 = vpop.f32.mrb[37].mxu0  ;;  %s3195_s20 = scalar_lea.vmem %s3810_s2, 128 }
 0x73a   : > { %v1736_v14 = vpop.f32.mrb[65].mxu1  ;;  %v1689_v15 = vpop.f32.mrb[38].mxu0  ;;  %p3196_p4 = scmp.ne.s32.totalorder %s3810_s2, %s3195_s20  ;;  %p3203_p1 = scmp.lt.s32.totalorder %s3201_s24, %s3195_s20 }
 0x73b   : > { %v2783_v25 = vpop.f32.mrb[66].mxu1  ;;  %v2763_v34 = vpop.f32.mrb[39].mxu0 }
 0x73c   : > { %v1800_v35 = vpack.c.bf16 %v2783_v25, %v2782_v12  ;;  %v1739_v36 = vpop.f32.mrb[67].mxu1  ;;  %p3197_p8 = pnand %p3196_p4, %p3909_p7  ;;  %p3204_p0 = por %p3203_p1, %p3202_p13 }
 0x73d   : > { %v1799_v37 = vpack.c.bf16 %v1739_v36, %v1736_v14 }
 0x73e   : > { %p3198_p11 = pneg %p3197_p8 }
 0x73f   : > { %2800 = vmatprep.mubr.msk.bf16.mxu0 %vm1025_vm2, %v1799_v37 }
 0x740   : > { %2801 = vmatmul.mubr.msk.bf16.vlgmr.msra.gmra.mrb[40].mxu0 %vm1025_vm2, %v1800_v35  ;;  %p3205_p6 = pnand %p3204_p0, %p3198_p11 }
 0x741   : > { %v2786_v39 = vpop.f32.mrb[68].mxu1  ;;  %2817 = vmatpush3.bf16.msra.mxu0 %v2997_v10 }
 0x742   : > { %v1752_v40 = vpop.f32.mrb[69].mxu1  ;;  %2818 = vmatprep.subr.bf16.mxu0 %v2998_v38 }
 0x743   : > { %v2787_v41 = vpop.f32.mrb[70].mxu1 }
 0x744   : > { %v1802_v42 = vpack.c.bf16 %v2787_v41, %v2786_v39  ;;  %v1755_v4 = vpop.f32.mrb[71].mxu1 }
 0x745   : > { %v1801_v43 = vpack.c.bf16 %v1755_v4, %v1752_v40  ;;  %2819 = vmatpush3.bf16.msra.mxu0 %v2998_v38 }
 0x747   : > { %2804 = vmatprep.mubr.msk.bf16.mxu0 %vm1025_vm2, %v1801_v43 }
 0x748   : > { %2805 = vmatmul.mubr.msk.bf16.gmra.mrb[44].mxu0 %vm1025_vm2, %v1802_v42 }
 0x749   : > { %v2790_v45 = vpop.f32.mrb[72].mxu1 }
 0x74a   : > { %v1768_v47 = vpop.f32.mrb[73].mxu1 }
 0x74b   : > { %v2791_v48 = vpop.f32.mrb[74].mxu1 }
 0x74c   : > { %v1804_v44 = vpack.c.bf16 %v2791_v48, %v2790_v45  ;;  %v1771_v50 = vpop.f32.mrb[75].mxu1 }
 0x74d   : > { %v1803_v51 = vpack.c.bf16 %v1771_v50, %v1768_v47 }
 0x74f   : > { %2808 = vmatprep.mubr.msk.bf16.mxu0 %vm1025_vm2, %v1803_v51 }
 0x750   : > { %2809 = vmatmul.mubr.msk.bf16.gmra.mrb[48].mxu0 %vm1025_vm2, %v1804_v44 }
 0x751   : > { %v2794_v52 = vpop.f32.mrb[76].mxu1 }
 0x752   : > { %v1784_v54 = vpop.f32.mrb[77].mxu1 }
 0x753   : > { %v2795_v55 = vpop.f32.mrb[78].mxu1 }
 0x754   : > { %v1806_v56 = vpack.c.bf16 %v2795_v55, %v2794_v52  ;;  %v1787_v57 = vpop.f32.mrb[79].mxu1  ;;  %v2433_v55 = vld [vmem:[%s3864_s14] ss:$0 sm:$0xff] }
 0x755   : > { %v1805_v58 = vpack.c.bf16 %v1787_v57, %v1784_v54 }
 0x757   : > { %2812 = vmatprep.mubr.msk.bf16.mxu0 %vm1025_vm2, %v1805_v58 }
 0x758   : > { %2813 = vmatmul.mubr.msk.bf16.gmra.mrb[52].mxu0 %vm1025_vm2, %v1806_v56 }
 0x813   : > { %v2802_v60 = vpop.f32.mrb[40].mxu0 }
 0x814   : > { %v1892_v61 = vadd.f32 %v2802_v60, %v2422_v59  ;;  %v1883_v62 = vpop.f32.mrb[41].mxu0 }
 0x815   : > { %v1884_v63 = vadd.f32 %v2422_v59, %v1883_v62  ;;  %v2803_v0 = vpop.f32.mrb[42].mxu0 }
 0x816   : > { %v1895_v1 = vadd.f32 %v2803_v0, %v2422_v59  ;;  %v1886_v2 = vpop.f32.mrb[43].mxu0  ;;  %v1948_v5 = vmax.f32 %v1892_v61, 0.0 }
 0x817   : > { %v1887_v3 = vadd.f32 %v2422_v59, %v1886_v2  ;;  %v1946_v7 = vmax.f32 %v1884_v63, 0.0 }
 0x818   : > { %v1949_v6 = vmax.f32 %v1895_v1, 0.0 }
 0x819   : > { %v1947_v8 = vmax.f32 %v1887_v3, 0.0 }
 0x81a   : > { %v1963_v16 = vpack.c.bf16 %v1949_v6, %v1948_v5 }
 0x81b   : > { %v1962_v17 = vpack.c.bf16 %v1947_v8, %v1946_v7  ;;  %v2806_v18 = vpop.f32.mrb[44].mxu0 }
 0x81c   : > { %v1908_v19 = vadd.f32 %v2806_v18, %v2422_v59  ;;  %v1899_v20 = vpop.f32.mrb[45].mxu0 }
 0x81d   : > { %v1900_v21 = vadd.f32 %v2422_v59, %v1899_v20  ;;  %v2807_v22 = vpop.f32.mrb[46].mxu0  ;;  %2820 = vmatprep.mubr.msk.bf16.mxu0 %vm1025_vm2, %v1962_v17 }
 0x81e   : > { %v1911_v23 = vadd.f32 %v2807_v22, %v2422_v59  ;;  %v1902_v24 = vpop.f32.mrb[47].mxu0  ;;  %2821 = vmatmul.mubr.msk.bf16.vlgmr.msra.gmra.mrb[56].mxu0 %vm1025_vm2, %v1963_v16  ;;  %v1952_v27 = vmax.f32 %v1908_v19, 0.0 }
 0x81f   : > { %v1903_v26 = vadd.f32 %v2422_v59, %v1902_v24  ;;  %v1950_v29 = vmax.f32 %v1900_v21, 0.0 }
 0x820   : > { %v1953_v28 = vmax.f32 %v1911_v23, 0.0 }
 0x821   : > { %v1951_v31 = vmax.f32 %v1903_v26, 0.0 }
 0x822   : > { %v1965_v32 = vpack.c.bf16 %v1953_v28, %v1952_v27 }
 0x823   : > { %v1964_v33 = vpack.c.bf16 %v1951_v31, %v1950_v29  ;;  %v2810_v30 = vpop.f32.mrb[48].mxu0 }
 0x824   : > { %v1924_v9 = vadd.f32 %v2810_v30, %v2422_v59  ;;  %v1915_v10 = vpop.f32.mrb[49].mxu0 }
 0x825   : > { %v1916_v11 = vadd.f32 %v2422_v59, %v1915_v10  ;;  %v2811_v12 = vpop.f32.mrb[50].mxu0  ;;  %2824 = vmatprep.mubr.msk.bf16.mxu0 %vm1025_vm2, %v1964_v33 }
 0x826   : > { %v1927_v13 = vadd.f32 %v2811_v12, %v2422_v59  ;;  %v1918_v14 = vpop.f32.mrb[51].mxu0  ;;  %2825 = vmatmul.mubr.msk.bf16.gmra.mrb[60].mxu0 %vm1025_vm2, %v1965_v32  ;;  %v1956_v25 = vmax.f32 %v1924_v9, 0.0 }
 0x827   : > { %v1919_v15 = vadd.f32 %v2422_v59, %v1918_v14  ;;  %v1954_v35 = vmax.f32 %v1916_v11, 0.0 }
 0x828   : > { %v1957_v34 = vmax.f32 %v1927_v13, 0.0 }
 0x829   : > { %v1955_v36 = vmax.f32 %v1919_v15, 0.0 }
 0x82a   : > { %v1967_v37 = vpack.c.bf16 %v1957_v34, %v1956_v25 }
 0x82b   : > { %v1966_v38 = vpack.c.bf16 %v1955_v36, %v1954_v35  ;;  %v2814_v39 = vpop.f32.mrb[52].mxu0 }
 0x82c   : > { %v1940_v40 = vadd.f32 %v2814_v39, %v2422_v59  ;;  %v1931_v41 = vpop.f32.mrb[53].mxu0 }
 0x82d   : > { %v1932_v42 = vadd.f32 %v2422_v59, %v1931_v41  ;;  %v2815_v4 = vpop.f32.mrb[54].mxu0  ;;  %2828 = vmatprep.mubr.msk.bf16.mxu0 %vm1025_vm2, %v1966_v38 }
 0x82e   : > { %v1943_v43 = vadd.f32 %v2815_v4, %v2422_v59  ;;  %v1934_v45 = vpop.f32.mrb[55].mxu0  ;;  %2829 = vmatmul.mubr.msk.bf16.gmra.mrb[64].mxu0 %vm1025_vm2, %v1967_v37  ;;  %v1960_v48 = vmax.f32 %v1940_v40, 0.0 }
 0x82f   : > { %v1935_v47 = vadd.f32 %v2422_v59, %v1934_v45  ;;  %v1958_v50 = vmax.f32 %v1932_v42, 0.0 }
 0x830   : > { %v1961_v44 = vmax.f32 %v1943_v43, 0.0 }
 0x831   : > { %v1959_v51 = vmax.f32 %v1935_v47, 0.0 }
 0x832   : > { %v1969_v52 = vpack.c.bf16 %v1961_v44, %v1960_v48 }
 0x833   : > { %v1968_v54 = vpack.c.bf16 %v1959_v51, %v1958_v50 }
 0x835   : > { %2832 = vmatprep.mubr.msk.bf16.mxu0 %vm1025_vm2, %v1968_v54 }
 0x836   : > { %2833 = vmatmul.mubr.msk.bf16.gmra.mrb[68].mxu0 %vm1025_vm2, %v1969_v52 }
 0x8f1   : > { %v2822_v56 = vpop.f32.mrb[56].mxu0 }
 0x8f2   : > { %v2055_v57 = vadd.f32 %v2822_v56, %v2433_v55  ;;  %v2046_v58 = vpop.f32.mrb[57].mxu0 }
 0x8f3   : > { %v2047_v60 = vadd.f32 %v2433_v55, %v2046_v58  ;;  %v2823_v61 = vpop.f32.mrb[58].mxu0 }
 0x8f4   : > { %v2058_v59 = vadd.f32 %v2823_v61, %v2433_v55  ;;  %v2049_v62 = vpop.f32.mrb[59].mxu0  ;;  %v2111_v0 = vmax.f32 %v2055_v57, 0.0 }
 0x8f5   : > { %v2050_v63 = vadd.f32 %v2433_v55, %v2049_v62  ;;  %v2109_v2 = vmax.f32 %v2047_v60, 0.0 }
 0x8f6   : > { %v2112_v1 = vmax.f32 %v2058_v59, 0.0 }
 0x8f7   : > { %v2110_v3 = vmax.f32 %v2050_v63, 0.0 }
 0x8f8   : > { %v2126_v5 = vpack.c.bf16 %v2112_v1, %v2111_v0 }
 0x8f9   : > { %v2125_v6 = vpack.c.bf16 %v2110_v3, %v2109_v2  ;;  %v2826_v7 = vpop.f32.mrb[60].mxu0 }
 0x8fa   : > { %v2071_v8 = vadd.f32 %v2826_v7, %v2433_v55  ;;  %v2062_v16 = vpop.f32.mrb[61].mxu0 }
 0x8fb   : > { %v2063_v17 = vadd.f32 %v2433_v55, %v2062_v16  ;;  %v2827_v18 = vpop.f32.mrb[62].mxu0  ;;  %2837 = vmatpush3.bf16.msra.mxu1 %v2125_v6 }
 0x8fc   : > { %v2074_v19 = vadd.f32 %v2827_v18, %v2433_v55  ;;  %v2065_v20 = vpop.f32.mrb[63].mxu0  ;;  %2838 = vmatprep.subr.bf16.mxu1 %v3284_v46  ;;  %v2115_v22 = vmax.f32 %v2071_v8, 0.0 }
 0x8fd   : > { %v2066_v21 = vadd.f32 %v2433_v55, %v2065_v20  ;;  %v2113_v24 = vmax.f32 %v2063_v17, 0.0 }
 0x8fe   : > { %v2116_v23 = vmax.f32 %v2074_v19, 0.0 }
 0x8ff   : > { %v2114_v26 = vmax.f32 %v2066_v21, 0.0  ;;  %2839 = vmatpush3.bf16.msra.mxu1 %v2126_v5 }
 0x900   : > { %v2128_v27 = vpack.c.bf16 %v2116_v23, %v2115_v22  ;;  %2840 = vmatprep.subr.bf16.mxu1 %v3284_v46 }
 0x901   : > { %v2127_v28 = vpack.c.bf16 %v2114_v26, %v2113_v24  ;;  %v2830_v29 = vpop.f32.mrb[64].mxu0 }
 0x902   : > { %v2087_v31 = vadd.f32 %v2830_v29, %v2433_v55  ;;  %v2078_v32 = vpop.f32.mrb[65].mxu0 }
 0x903   : > { %v2079_v33 = vadd.f32 %v2433_v55, %v2078_v32  ;;  %v2831_v30 = vpop.f32.mrb[66].mxu0  ;;  %2841 = vmatpush3.bf16.msra.mxu1 %v2127_v28 }
 0x904   : > { %v2090_v9 = vadd.f32 %v2831_v30, %v2433_v55  ;;  %v2081_v10 = vpop.f32.mrb[67].mxu0  ;;  %2842 = vmatprep.subr.bf16.mxu1 %v3284_v46  ;;  %v2119_v12 = vmax.f32 %v2087_v31, 0.0 }
 0x905   : > { %v2082_v11 = vadd.f32 %v2433_v55, %v2081_v10  ;;  %v2117_v14 = vmax.f32 %v2079_v33, 0.0 }
 0x906   : > { %v2120_v13 = vmax.f32 %v2090_v9, 0.0 }
 0x907   : > { %v2118_v15 = vmax.f32 %v2082_v11, 0.0  ;;  %2843 = vmatpush3.bf16.msra.mxu1 %v2128_v27 }
 0x908   : > { %v2130_v25 = vpack.c.bf16 %v2120_v13, %v2119_v12  ;;  %2844 = vmatprep.subr.bf16.mxu1 %v3284_v46 }
 0x909   : > { %v2129_v34 = vpack.c.bf16 %v2118_v15, %v2117_v14  ;;  %v2834_v35 = vpop.f32.mrb[68].mxu0 }
 0x90a   : > { %v2103_v36 = vadd.f32 %v2834_v35, %v2433_v55  ;;  %v2094_v37 = vpop.f32.mrb[69].mxu0 }
 0x90b   : > { %v2095_v38 = vadd.f32 %v2433_v55, %v2094_v37  ;;  %v2835_v39 = vpop.f32.mrb[70].mxu0  ;;  %2845 = vmatpush3.bf16.msra.mxu1 %v2129_v34 }
 0x90c   : > { %v2106_v40 = vadd.f32 %v2835_v39, %v2433_v55  ;;  %v2097_v41 = vpop.f32.mrb[71].mxu0  ;;  %2846 = vmatprep.subr.bf16.mxu1 %v3284_v46  ;;  %v2123_v4 = vmax.f32 %v2103_v36, 0.0 }
 0x90d   : > { %v2098_v42 = vadd.f32 %v2433_v55, %v2097_v41  ;;  %v2121_v45 = vmax.f32 %v2095_v38, 0.0  ;;  %v2175_v55 = vpop.permute.xlu0 %2174 }
 0x90e   : > { %v2124_v43 = vmax.f32 %v2106_v40, 0.0 }
 0x90f   : > { %v2122_v47 = vmax.f32 %v2098_v42, 0.0  ;;  %2847 = vmatpush3.bf16.msra.mxu1 %v2130_v25 }
 0x910   : > { %v2132_v48 = vpack.c.bf16 %v2124_v43, %v2123_v4  ;;  %2848 = vmatprep.subr.bf16.mxu1 %v3284_v46 }
 0x911   : > { %v2131_v44 = vpack.c.bf16 %v2122_v47, %v2121_v45 }
 0x913   : > { %2849 = vmatpush3.bf16.msra.mxu1 %v2131_v44 }
 0x914   : > { %2850 = vmatprep.subr.bf16.mxu1 %v3284_v46  ;;  %v2181_v46 = vsel %vm1025_vm2, %v3708_v53, %v2175_v55 }
 0x917   : > { %2851 = vmatpush3.bf16.msra.mxu1 %v2132_v48 }
 0x91a   : > { %2853 = vmatmul.mubr.bf16.vlgmr.msra.gmra.mrb[80].mxu1 %v3694_v49 }
 0x9ed   : > { %v2167_v50 = vpop.f32.mrb[80].mxu1 }
 0x9ee   : > { %2178 = vrot.lane.b32.xlu0 %v2167_v50, %s3287_s28  ;;  %v2854_v51 = vpop.f32.mrb[81].mxu1 }
 0x9ef   : > { %v2170_v52 = vpop.f32.mrb[82].mxu1 }
 0x9f0   : > { %v2855_v54 = vpop.f32.mrb[83].mxu1 }
 0xa60   : > { %v2179_v56 = vpop.permute.xlu0 %2178 }
 0xa61   : > { %v2183_v49 = vsel %vm2182_vm4, %v2181_v46, %v2179_v56 }
 0xa62   : > { %v2185_v57 = vsel %vm2184_vm5, %v2183_v49, 0.0 }
 0xa63   : > { %2186 = vst [vmem:[%s596_s21] sm:$0xff] %v2185_v57 }
 0xa64   : > { %3208 = shalt.err (!%p3205_p6)
}
 0xa65   : > { %s3209_s17 = scalar_lea.hbm %s3808_s15, 128  ;;  %s3213_s19 = scalar_lea.hbm %s3908_s23, 256 }
 0xa66   : > { %p3210_p5 = scmp.ne.s32.totalorder %s3808_s15, %s3209_s17  ;;  %p3214_p10 = scmp.lt.u32.totalorder %s3808_s15, %s3908_s23 }
 0xa67   : > { %p3215_p2 = scmp.lt.u32.totalorder %s3213_s19, %s3209_s17  ;;  %p3217_p4 = scmp.lt.u32.totalorder %s3209_s17, %s3808_s15 }
 0xa68   : > { %p3211_p9 = pnand %p3210_p5, %p3909_p7 }
 0xa69   : > { %p3216_p3 = por %p3215_p2, %p3214_p10 }
 0xa6a   : > { %p3212_p12 = pneg %p3211_p9 }
 0xa6b   : > { %p3218_p8 = por %p3217_p4, %p3216_p3 }
 0xa6d   : > { %p3219_p11 = pnand %p3218_p8, %p3212_p12 }
 0xa6f   : > { %3222 = shalt.err (!%p3219_p11)
}
 0xa70   : > { %2885 = dma.vmem_to_hbm [thread:$0]  (%p3909_p7), %s3810_s2, 128, %s3808_s15, %s2188_s22  }
 0xa71 PF: > { %s3910_s21 = sld [smem:[#allocation23_spill]]  ;;  %s3911_s30 = sld [smem:[#allocation20_spill]] }
 0xa72   : > { %s3912_s26 = sld [smem:[#allocation27_spill]] }
 0xa77   : > { %p2927_p13 = scmp.ge.s32.totalorder %s3910_s21, 2  ;;  %s2213_s20 = sand.u32 1, %s3911_s30  }
 0xa78   : > { %p3913_p1 = scmp.ne.s32.totalorder %s3912_s26, 0  ;;  %s2214_s29 = scalar_lea.sflag [#allocation4], %s2213_s20 }
 0xa7a   : > { %p2910_p0 = pnand %p2927_p13, %p3913_p1 }
 0xa7c   : > { %3256 = dma.done.wait (!%p2910_p0), %s2214_s29, 128  }
 0xa7d   : > { %3258 = vsyncadd (!%p2910_p0), %s2214_s29, 4294967168  ;;  %s3914_s21 = sld [smem:[#allocation24_spill]]  ;;  %s3915_s18 = sld [smem:[#allocation21_spill]] }
 0xa7e   : > { %s3916_s19 = sld [smem:[#allocation22_spill]]  ;;  %s3917_s20 = sld [smem:[#allocation25_spill]] }
 0xa83   : > { %p29_p6 = scmp.ge.s32.totalorder %s3914_s21, 4  }
 0xa85   :  { %31 = sbr.rel (!%p29_p6) target bundleno = 11 (0xb), region = 147 }
 0xa8c   :  { %2219 = vsyncpa [#allocation3], 1 }
 0xa8d   :  { %2221 = vsyncpa [#allocation3 + $0x1], 1 }
 0xa8e   :  { %2222 = vsyncpa [#allocation6], 1 }
 0xa8f   :  { %2223 = vsyncpa [#allocation9], 1 }
 0xa90   :  { %2224 = vsyncpa [#allocation12], 1 }
 0xa91   :  { %2225 = vsyncpa [#allocation4], 1 }
 0xa92   :  { %2227 = vsyncpa [#allocation4 + $0x1], 1 }

</bundles_post_ra>
